<compile_context>
chip_gen: v7x
topology: tpu7x:2x2x1
jax: 0.10.0
libtpu: 0.0.40
codegen_flags: <defaults>
</compile_context>

<pallas_src>
import jax
import jax.numpy as jnp
from jax import lax
from jax.experimental import pallas as pl
from jax.experimental.pallas import tpu as pltpu


def _round_up(x, m):
    return ((x + m - 1) // m) * m


def mlp_kernel(x_ref, w1_ref, b1_ref, w2_ref, b2_ref, o_ref):
    # W is stored [out, in] (torch nn.Linear layout); contract x's last dim against
    # W's last dim -> y = x @ W.T with no transposed weight copy in HBM.
    dn = (((1,), (1,)), ((), ()))
    # Layer 1: Linear + ReLU (f32 accumulation, f32 bias).
    h = lax.dot_general(x_ref[...], w1_ref[...], dn,
                        preferred_element_type=jnp.float32)
    h = jnp.maximum(h + b1_ref[...], 0.0)          # b1 is (1, H) f32, broadcasts
    # Layer 2: Linear (re-cast h to the bf16 compute dtype for the MXU).
    y = lax.dot_general(h.astype(w2_ref.dtype), w2_ref[...], dn,
                        preferred_element_type=jnp.float32)
    o_ref[...] = (y + b2_ref[...]).astype(o_ref.dtype)


def custom_five_layer_nn(x, w1, b1, w2, b2, *, tile_b=256,
                         compute_dtype=jnp.bfloat16):
    """x: [B, H]; w1, w2: [H, H] (PyTorch [out, in]); b1, b2: [H]."""
    B, H = x.shape
    out_dtype = x.dtype

    # bf16 compute operands; f32 biases (added to the f32 accumulator).
    xc = jnp.asarray(x).astype(compute_dtype)
    w1c = jnp.asarray(w1).astype(compute_dtype)
    w2c = jnp.asarray(w2).astype(compute_dtype)
    b1r = jnp.asarray(b1).astype(jnp.float32).reshape(1, H)
    b2r = jnp.asarray(b2).astype(jnp.float32).reshape(1, H)

    # Batch tile: as large as requested, multiple of 8 sublanes, no larger than the
    # (padded) batch.  Ragged batches are zero-padded and sliced off afterwards.
    tb = _round_up(max(8, min(tile_b, _round_up(B, 8))), 8)
    b_pad = _round_up(B, tb)
    if b_pad != B:
        xc = jnp.pad(xc, ((0, b_pad - B), (0, 0)))
    grid = (b_pad // tb,)

    c_bytes = jnp.dtype(compute_dtype).itemsize
    o_bytes = jnp.dtype(out_dtype).itemsize
    # VMEM budget: single-buffered weights + double-buffered x/out tiles + f32 temps.
    vmem_need = (2 * H * H * c_bytes + 2 * H * 4
                 + 2 * tb * H * c_bytes + 2 * tb * H * o_bytes + 2 * tb * H * 4)
    vmem_limit = int(min(max(2 * vmem_need, 32 * 2**20), 64 * 2**20))

    cost = pl.CostEstimate(
        flops=4 * b_pad * H * H,
        transcendentals=0,
        bytes_accessed=(2 * H * H * c_bytes + 2 * H * 4
                        + b_pad * H * (c_bytes + o_bytes)),
    )

    def run(single_buffer_weights):
        if single_buffer_weights:
            # Whole weight/bias arrays resident in VMEM, single-buffered (no pipelining).
            w1_spec = pl.BlockSpec(memory_space=pltpu.MemorySpace.VMEM)
            b1_spec = pl.BlockSpec(memory_space=pltpu.MemorySpace.VMEM)
            w2_spec = pl.BlockSpec(memory_space=pltpu.MemorySpace.VMEM)
            b2_spec = pl.BlockSpec(memory_space=pltpu.MemorySpace.VMEM)
        else:
            w1_spec = pl.BlockSpec((H, H), lambda i: (0, 0))
            b1_spec = pl.BlockSpec((1, H), lambda i: (0, 0))
            w2_spec = pl.BlockSpec((H, H), lambda i: (0, 0))
            b2_spec = pl.BlockSpec((1, H), lambda i: (0, 0))
        return pl.pallas_call(
            mlp_kernel,
            out_shape=jax.ShapeDtypeStruct((b_pad, H), out_dtype),
            grid_spec=pltpu.PrefetchScalarGridSpec(
                num_scalar_prefetch=0,
                grid=grid,
                in_specs=[
                    pl.BlockSpec((tb, H), lambda i: (i, 0)),   # x tile (pipelined)
                    w1_spec, b1_spec, w2_spec, b2_spec,        # resident params
                ],
                out_specs=pl.BlockSpec((tb, H), lambda i: (i, 0)),
            ),
            compiler_params=pltpu.CompilerParams(
                dimension_semantics=("parallel",),
                vmem_limit_bytes=vmem_limit),
            cost_estimate=cost,
        )(xc, w1c, b1r, w2c, b2r)

    try:
        out = run(single_buffer_weights=True)
    except Exception:
        # Fallback for Pallas versions that reject memory_space-only input specs:
        # constant-index blocked specs (still resident, just double-buffered).
        out = run(single_buffer_weights=False)
    return out[:B]


def reference(x, w1, b1, w2, b2, compute_dtype=jnp.bfloat16):
    # Mirrors the kernel's numerics: bf16 operands, f32 accumulation, f32 bias add.
    dn = (((1,), (1,)), ((), ()))
    h = lax.dot_general(x.astype(compute_dtype), w1.astype(compute_dtype), dn,
                        preferred_element_type=jnp.float32)
    h = jnp.maximum(h + b1[None, :].astype(jnp.float32), 0.0)
    y = lax.dot_general(h.astype(compute_dtype), w2.astype(compute_dtype), dn,
                        preferred_element_type=jnp.float32)
    return (y + b2[None, :].astype(jnp.float32)).astype(x.dtype)


if __name__ == "__main__":
    B, H = 512, 256      # hid_dim = 256 (lane-aligned); grid has 2 parallel steps.
    key = jax.random.PRNGKey(0)
    kx, k1, kb1, k2, kb2 = jax.random.split(key, 5)

    x = jax.random.normal(kx, (B, H), dtype=jnp.float32)
    # PyTorch nn.Linear init: W [out, in], b [out], U(-1/sqrt(in), 1/sqrt(in)).
    bound = 1.0 / (H ** 0.5)
    w1 = jax.random.uniform(k1, (H, H), jnp.float32, -bound, bound)
    b1 = jax.random.uniform(kb1, (H,), jnp.float32, -bound, bound)
    w2 = jax.random.uniform(k2, (H, H), jnp.float32, -bound, bound)
    b2 = jax.random.uniform(kb2, (H,), jnp.float32, -bound, bound)

    out = custom_five_layer_nn(x, w1, b1, w2, b2, tile_b=256)
    out = jax.block_until_ready(out)

    ref = reference(x, w1, b1, w2, b2)
    assert out.shape == (B, H)
    assert jnp.allclose(out, ref, atol=1e-2, rtol=1e-2), \
        float(jnp.max(jnp.abs(out - ref)))
    print("KERNEL_OK")
</pallas_src>

<mosaic_0001>
module attributes {stable_mosaic.version = 11 : i64} {
  func.func @mlp_kernel(%arg0: i32, %arg1: memref<256x256xbf16, #tpu.memory_space<vmem>>, %arg2: memref<256x256xbf16, #tpu.memory_space<vmem>>, %arg3: memref<1x256xf32, #tpu.memory_space<vmem>>, %arg4: memref<256x256xbf16, #tpu.memory_space<vmem>>, %arg5: memref<1x256xf32, #tpu.memory_space<vmem>>, %arg6: memref<256x256xf32, #tpu.memory_space<vmem>>) attributes {dimension_semantics = [#tpu.dimension_semantics<parallel>], iteration_bounds = array<i64: 2>, scalar_prefetch = 0 : i64, scratch_operands = 0 : i64, tpu.core_type = #tpu.core_type<tc>, window_params = [{transform_indices = @transform_0, window_bounds = array<i64: 256, 256>}, {pipeline_mode = #tpu.pipeline_mode<synchronous>, transform_indices = @transform_1, window_bounds = array<i64: 256, 256>}, {pipeline_mode = #tpu.pipeline_mode<synchronous>, transform_indices = @transform_2, window_bounds = array<i64: 1, 256>}, {pipeline_mode = #tpu.pipeline_mode<synchronous>, transform_indices = @transform_3, window_bounds = array<i64: 256, 256>}, {pipeline_mode = #tpu.pipeline_mode<synchronous>, transform_indices = @transform_4, window_bounds = array<i64: 1, 256>}, {transform_indices = @transform_5, window_bounds = array<i64: 256, 256>}]} {
    %c0 = arith.constant 0 : index
    %c0_0 = arith.constant 0 : index
    %0 = vector.load %arg1[%c0, %c0_0] : memref<256x256xbf16, #tpu.memory_space<vmem>>, vector<256x256xbf16>
    %c0_1 = arith.constant 0 : index
    %c0_2 = arith.constant 0 : index
    %1 = vector.load %arg2[%c0_1, %c0_2] : memref<256x256xbf16, #tpu.memory_space<vmem>>, vector<256x256xbf16>
    %cst = arith.constant dense<0.000000e+00> : vector<256x256xf32>
    %2 = tpu.matmul %0, %1, %cst {dimension_numbers = #tpu.dot_dimension_numbers<[1], [1], [0], [0], [0, 0, 1, 0], [], []>} : vector<256x256xbf16>, vector<256x256xbf16>, vector<256x256xf32> -> vector<256x256xf32>
    %c0_3 = arith.constant 0 : index
    %c0_4 = arith.constant 0 : index
    %3 = vector.load %arg3[%c0_3, %c0_4] : memref<1x256xf32, #tpu.memory_space<vmem>>, vector<1x256xf32>
    %4 = vector.broadcast %3 : vector<1x256xf32> to vector<256x256xf32>
    %5 = arith.addf %2, %4 : vector<256x256xf32>
    %cst_5 = arith.constant 0.000000e+00 : f32
    %6 = vector.broadcast %cst_5 : f32 to vector<256x256xf32>
    %7 = arith.maximumf %5, %6 : vector<256x256xf32>
    %8 = arith.truncf %7 : vector<256x256xf32> to vector<256x256xbf16>
    %c0_6 = arith.constant 0 : index
    %c0_7 = arith.constant 0 : index
    %9 = vector.load %arg4[%c0_6, %c0_7] : memref<256x256xbf16, #tpu.memory_space<vmem>>, vector<256x256xbf16>
    %cst_8 = arith.constant dense<0.000000e+00> : vector<256x256xf32>
    %10 = tpu.matmul %8, %9, %cst_8 {dimension_numbers = #tpu.dot_dimension_numbers<[1], [1], [0], [0], [0, 0, 1, 0], [], []>} : vector<256x256xbf16>, vector<256x256xbf16>, vector<256x256xf32> -> vector<256x256xf32>
    %c0_9 = arith.constant 0 : index
    %c0_10 = arith.constant 0 : index
    %11 = vector.load %arg5[%c0_9, %c0_10] : memref<1x256xf32, #tpu.memory_space<vmem>>, vector<1x256xf32>
    %12 = vector.broadcast %11 : vector<1x256xf32> to vector<256x256xf32>
    %13 = arith.addf %10, %12 : vector<256x256xf32>
    %c0_11 = arith.constant 0 : index
    %c0_12 = arith.constant 0 : index
    %14 = vector.load %arg6[%c0_11, %c0_12] : memref<256x256xf32, #tpu.memory_space<vmem>>, vector<256x256xf32>
    tpu.vector_store %arg6[%c0_11, %c0_12], %13 {strides = array<i32>} : memref<256x256xf32, #tpu.memory_space<vmem>>, vector<256x256xf32>,
    return
  }
  func.func @transform_0(%arg0: i32) -> (i32, i32) {
    %c0_i32 = arith.constant 0 : i32
    %c0_i32_0 = arith.constant 0 : i32
    return %arg0, %c0_i32 : i32, i32
  }
  func.func @transform_1(%arg0: i32) -> (i32, i32) {
    %c0_i32 = arith.constant 0 : i32
    %c0_i32_0 = arith.constant 0 : i32
    %c0_i32_1 = arith.constant 0 : i32
    return %c0_i32, %c0_i32_0 : i32, i32
  }
  func.func @transform_2(%arg0: i32) -> (i32, i32) {
    %c0_i32 = arith.constant 0 : i32
    %c0_i32_0 = arith.constant 0 : i32
    %c0_i32_1 = arith.constant 0 : i32
    return %c0_i32, %c0_i32_0 : i32, i32
  }
  func.func @transform_3(%arg0: i32) -> (i32, i32) {
    %c0_i32 = arith.constant 0 : i32
    %c0_i32_0 = arith.constant 0 : i32
    %c0_i32_1 = arith.constant 0 : i32
    return %c0_i32, %c0_i32_0 : i32, i32
  }
  func.func @transform_4(%arg0: i32) -> (i32, i32) {
    %c0_i32 = arith.constant 0 : i32
    %c0_i32_0 = arith.constant 0 : i32
    %c0_i32_1 = arith.constant 0 : i32
    return %c0_i32, %c0_i32_0 : i32, i32
  }
  func.func @transform_5(%arg0: i32) -> (i32, i32) {
    %c0_i32 = arith.constant 0 : i32
    %c0_i32_0 = arith.constant 0 : i32
    return %arg0, %c0_i32 : i32, i32
  }
}

module attributes {stable_mosaic.version = 11 : i64} {
  func.func @mlp_kernel(%arg0: i32, %arg1: memref<256x256xbf16, #tpu.memory_space<vmem>>, %arg2: memref<256x256xbf16, #tpu.memory_space<vmem>>, %arg3: memref<1x256xf32, #tpu.memory_space<vmem>>, %arg4: memref<256x256xbf16, #tpu.memory_space<vmem>>, %arg5: memref<1x256xf32, #tpu.memory_space<vmem>>, %arg6: memref<256x256xf32, #tpu.memory_space<vmem>>) attributes {dimension_semantics = [#tpu.dimension_semantics<parallel>], iteration_bounds = array<i64: 2>, scalar_prefetch = 0 : i64, scratch_operands = 0 : i64, tpu.core_type = #tpu.core_type<tc>, window_params = [{transform_indices = @transform_0, window_bounds = array<i64: 256, 256>}, {pipeline_mode = #tpu.pipeline_mode<synchronous>, transform_indices = @transform_1, window_bounds = array<i64: 256, 256>}, {pipeline_mode = #tpu.pipeline_mode<synchronous>, transform_indices = @transform_2, window_bounds = array<i64: 1, 256>}, {pipeline_mode = #tpu.pipeline_mode<synchronous>, transform_indices = @transform_3, window_bounds = array<i64: 256, 256>}, {pipeline_mode = #tpu.pipeline_mode<synchronous>, transform_indices = @transform_4, window_bounds = array<i64: 1, 256>}, {transform_indices = @transform_5, window_bounds = array<i64: 256, 256>}]} {
    %c0 = arith.constant 0 : index
    %c0_0 = arith.constant 0 : index
    %0 = vector.load %arg1[%c0, %c0_0] : memref<256x256xbf16, #tpu.memory_space<vmem>>, vector<256x256xbf16>
    %c0_1 = arith.constant 0 : index
    %c0_2 = arith.constant 0 : index
    %1 = vector.load %arg2[%c0_1, %c0_2] : memref<256x256xbf16, #tpu.memory_space<vmem>>, vector<256x256xbf16>
    %cst = arith.constant dense<0.000000e+00> : vector<256x256xf32>
    %2 = tpu.matmul %0, %1, %cst {dimension_numbers = #tpu.dot_dimension_numbers<[1], [1], [0], [0], [0, 0, 1, 0], [], []>} : vector<256x256xbf16>, vector<256x256xbf16>, vector<256x256xf32> -> vector<256x256xf32>
    %c0_3 = arith.constant 0 : index
    %c0_4 = arith.constant 0 : index
    %3 = vector.load %arg3[%c0_3, %c0_4] : memref<1x256xf32, #tpu.memory_space<vmem>>, vector<1x256xf32>
    %4 = vector.broadcast %3 : vector<1x256xf32> to vector<256x256xf32>
    %5 = arith.addf %2, %4 : vector<256x256xf32>
    %cst_5 = arith.constant 0.000000e+00 : f32
    %6 = vector.broadcast %cst_5 : f32 to vector<256x256xf32>
    %7 = arith.maximumf %5, %6 : vector<256x256xf32>
    %8 = arith.truncf %7 : vector<256x256xf32> to vector<256x256xbf16>
    %c0_6 = arith.constant 0 : index
    %c0_7 = arith.constant 0 : index
    %9 = vector.load %arg4[%c0_6, %c0_7] : memref<256x256xbf16, #tpu.memory_space<vmem>>, vector<256x256xbf16>
    %cst_8 = arith.constant dense<0.000000e+00> : vector<256x256xf32>
    %10 = tpu.matmul %8, %9, %cst_8 {dimension_numbers = #tpu.dot_dimension_numbers<[1], [1], [0], [0], [0, 0, 1, 0], [], []>} : vector<256x256xbf16>, vector<256x256xbf16>, vector<256x256xf32> -> vector<256x256xf32>
    %c0_9 = arith.constant 0 : index
    %c0_10 = arith.constant 0 : index
    %11 = vector.load %arg5[%c0_9, %c0_10] : memref<1x256xf32, #tpu.memory_space<vmem>>, vector<1x256xf32>
    %12 = vector.broadcast %11 : vector<1x256xf32> to vector<256x256xf32>
    %13 = arith.addf %10, %12 : vector<256x256xf32>
    %c0_11 = arith.constant 0 : index
    %c0_12 = arith.constant 0 : index
    %14 = vector.load %arg6[%c0_11, %c0_12] : memref<256x256xf32, #tpu.memory_space<vmem>>, vector<256x256xf32>
    tpu.vector_store %arg6[%c0_11, %c0_12], %13 {strides = array<i32>} : memref<256x256xf32, #tpu.memory_space<vmem>>, vector<256x256xf32>,
    return
  }
  func.func @transform_0(%arg0: i32) -> (i32, i32) {
    %c0_i32 = arith.constant 0 : i32
    %c0_i32_0 = arith.constant 0 : i32
    return %arg0, %c0_i32 : i32, i32
  }
  func.func @transform_1(%arg0: i32) -> (i32, i32) {
    %c0_i32 = arith.constant 0 : i32
    %c0_i32_0 = arith.constant 0 : i32
    %c0_i32_1 = arith.constant 0 : i32
    return %c0_i32, %c0_i32_0 : i32, i32
  }
  func.func @transform_2(%arg0: i32) -> (i32, i32) {
    %c0_i32 = arith.constant 0 : i32
    %c0_i32_0 = arith.constant 0 : i32
    %c0_i32_1 = arith.constant 0 : i32
    return %c0_i32, %c0_i32_0 : i32, i32
  }
  func.func @transform_3(%arg0: i32) -> (i32, i32) {
    %c0_i32 = arith.constant 0 : i32
    %c0_i32_0 = arith.constant 0 : i32
    %c0_i32_1 = arith.constant 0 : i32
    return %c0_i32, %c0_i32_0 : i32, i32
  }
  func.func @transform_4(%arg0: i32) -> (i32, i32) {
    %c0_i32 = arith.constant 0 : i32
    %c0_i32_0 = arith.constant 0 : i32
    %c0_i32_1 = arith.constant 0 : i32
    return %c0_i32, %c0_i32_0 : i32, i32
  }
  func.func @transform_5(%arg0: i32) -> (i32, i32) {
    %c0_i32 = arith.constant 0 : i32
    %c0_i32_0 = arith.constant 0 : i32
    return %arg0, %c0_i32 : i32, i32
  }
}

</mosaic_0001>

<bundles_post_ra>
// kernel: tpu_custom_call.1
= control target key start
LH: loop header
LB: loop body
LE: loop exit
PB: predicated region body
PF: predicated region fallthrough
CT: control target
= control target key end

     0   :  { %10 = vsyncpa [#allocation3], 0  ;;  %s2558_s0 = inlined_call_operand.hbm [shape: bf16[512,256], index: 0, kind: input, shape index: {}]   ;;  %s2559_s1 = inlined_call_operand.hbm [shape: bf16[256,256], index: 1, kind: input, shape index: {}]   ;;  %s2560_s2 = inlined_call_operand.vmem [shape: f32[1,256], index: 2, kind: input, shape index: {}]   ;;  %s2561_s3 = inlined_call_operand.hbm [shape: bf16[256,256], index: 3, kind: input, shape index: {}]   ;;  %s2562_s4 = inlined_call_operand.vmem [shape: f32[1,256], index: 4, kind: input, shape index: {}]   ;;  %s2563_s5 = inlined_call_operand.hbm [shape: f32[512,256], index: 5, kind: output, shape index: {}]  }
   0x1   :  { %12 = vsyncpa [#allocation3 + $0x1], 0 }
   0x2   :  { %13 = vsyncpa [#allocation6], 0 }
   0x3   :  { %14 = vsyncpa [#allocation4], 0 }
   0x4   :  { %16 = vsyncpa [#allocation4 + $0x1], 0  ;;  %s2059_s18 = smov 0   ;;  %s2061_s19 = smov 0  }
   0x5   :  { %s2063_s20 = smov 0   ;;  %s2065_s21 = smov 0  }
   0x6 LB: > { %s2080_s22 = sadd.s32 4294967295, %s2019_s21   ;;  %s1528_s23 = sadd.s32 4294967294, %s2019_s21   ;;  %s2019_s21 = sphi %s2065_s21, %s2583_s21   ;;  %s2015_s20 = sphi %s2063_s20, %s2582_s20   ;;  %s2011_s19 = sphi %s2061_s19, %s2581_s19   ;;  %s2007_s18 = sphi %s2059_s18, %s2580_s18  }
   0x7   : > { %p42_p0 = scmp.ne.s32.totalorder %s2011_s19, %s2007_s18  ;;  %p2564_p1 = scmp.eq.s32.totalorder %s2080_s22, 0 }
   0x8   : > { %p156_p3 = scmp.eq.s32.totalorder %s1528_s23, 1  ;;  %p1529_p5 = scmp.ge.s32.totalorder %s2019_s21, 1 }
   0x9   : > { %p2089_p4 = por %p2564_p1, %p42_p0  ;;  %p163_p7 = scmp.lt.s32.totalorder %s2019_s21, 3 }
   0xa   : > { %p2094_p6 = por %p156_p3, %p42_p0  ;;  %s2021_s27 = smov [#allocation5]  }
   0xb   : > { %s2567_s24 = scalar_select %p2089_p4, 1, 0 }
   0xc   : > { %s2568_s25 = scalar_select %p2094_p6, 1, 0 }
   0xd   : > { %p2099_p8 = pnand %p1529_p5, %p163_p7  ;;  %s175_s28 = sshll.u32 %s2021_s27, 4  ;;  %s2103_s28 = int_to_ptr.vmem [resolvable:$true] %s175_s28 }
   0xe   : > { %s2022_s30 = smov [#allocation7]   ;;  %s1863_s9 = scalar_lea.hbm %s2559_s1, 4096 }
   0xf   : > { %p1660_p9 = pneg %p2099_p8  ;;  %s191_s6 = sshll.u32 %s2022_s30, 4  ;;  %s2114_s6 = int_to_ptr.vmem [resolvable:$true] %s191_s6 }
  0x10   : > { %p1864_p12 = scmp.ne.s32.totalorder %s2559_s1, %s1863_s9  ;;  %p1870_p5 = scmp.lt.u32.totalorder %s1863_s9, %s2559_s1 }
  0x11   : > { %p2110_p11 = pnand %p1660_p9, %p2564_p1 }
  0x13   : > { %p1865_p13 = pneg %p2110_p11 }
  0x15   : > { %p1866_p0 = pnand %p1865_p13, %p1864_p12 }
  0x17   : > { %p1867_p3 = pneg %p1866_p0 }
  0x19   : > { %p1872_p7 = pnand %p1870_p5, %p1867_p3 }
  0x1b   : > { %1875 = shalt.err (!%p1872_p7)
}
  0x1c   : > { %s1876_s14 = scalar_lea.vmem %s2103_s28, 4096  ;;  %p1884_p2 = scmp.lt.s32.totalorder %s2103_s28, %s2103_s28 }
  0x1d   : > { %p1877_p9 = scmp.ne.s32.totalorder %s2103_s28, %s1876_s14  ;;  %p1885_p12 = scmp.lt.s32.totalorder %s1876_s14, %s1876_s14 }
  0x1f   : > { %p1879_p10 = pnand %p1877_p9, %p1865_p13  ;;  %p1886_p0 = por %p1885_p12, %p1884_p2 }
  0x21   : > { %p1880_p1 = pneg %p1879_p10 }
  0x23   : > { %p1887_p6 = pnand %p1886_p0, %p1880_p1 }
  0x25   : > { %1890 = shalt.err (!%p1887_p6)
}
  0x26   : > { %s2023_s15 = smov 128   ;;  %s2024_s16 = smov 8  }
  0x27   : > { %1663 = dma.hbm_to_vmem [thread:$0]  (!%p2110_p11), %s2559_s1, 4096, %s2103_s28, [#allocation6], %s2023_s15, %s2023_s15, %s2024_s16  }
  0x28   : > { %s1891_s7 = scalar_lea.hbm %s2561_s3, 4096 }
  0x29   : > { %p1892_p1 = scmp.ne.s32.totalorder %s2561_s3, %s1891_s7  ;;  %p1898_p10 = scmp.lt.u32.totalorder %s1891_s7, %s2561_s3 }
  0x2b   : > { %p1894_p2 = pnand %p1892_p1, %p1865_p13 }
  0x2d   : > { %p1895_p6 = pneg %p1894_p2 }
  0x2f   : > { %p1900_p3 = pnand %p1898_p10, %p1895_p6 }
  0x31   : > { %1903 = shalt.err (!%p1900_p3)
}
  0x32   : > { %s1904_s28 = scalar_lea.vmem %s2114_s6, 4096  ;;  %p1912_p12 = scmp.lt.s32.totalorder %s2114_s6, %s2114_s6 }
  0x33   : > { %p1905_p5 = scmp.ne.s32.totalorder %s2114_s6, %s1904_s28  ;;  %p1913_p0 = scmp.lt.s32.totalorder %s1904_s28, %s1904_s28 }
  0x35   : > { %p1907_p7 = pnand %p1905_p5, %p1865_p13  ;;  %p1914_p1 = por %p1913_p0, %p1912_p12 }
  0x37   : > { %p1908_p9 = pneg %p1907_p7 }
  0x39   : > { %p1915_p2 = pnand %p1914_p1, %p1908_p9 }
  0x3b   : > { %1918 = shalt.err (!%p1915_p2)
}
  0x3c   : > { %1666 = dma.hbm_to_vmem [thread:$0]  (!%p2110_p11), %s2561_s3, 4096, %s2114_s6, [#allocation6], %s2023_s15, %s2023_s15, %s2024_s16  }
  0x3d   : > { %s2175_s29 = sadd.s32 1, %s2019_s21   ;;  %s29_s14 = sadd.s32 1, %s2015_s20 }
  0x3e   : > { %s26_s17 = ssub.s32 %s2019_s21, %s2175_s29  ;;  %p36_p13 = scmp.ne.s32.totalorder %s2015_s20, %s2011_s19 }
  0x3f   : > { %p27_p6 = scmp.eq.s32.totalorder %s26_s17, 0  ;;  %p37_p10 = scmp.eq.s32.totalorder %s2019_s21, 0 }
  0x40   : > { %p2571_p3 = scmp.eq.s32.totalorder %s2080_s22, 1  ;;  %p1677_p7 = scmp.lt.s32.totalorder %s2019_s21, 2 }
  0x41   : > { %s2191_s27 = scalar_select %p27_p6, %s2015_s20, %s29_s14  }
  0x42   : > { %p2185_p5 = por %p2571_p3, %p36_p13  ;;  %p38_p9 = por %p37_p10, %p36_p13 }
  0x43   : > { %s208_s30 = sand.u32 1, %s2015_s20   ;;  %s1645_s6 = sshll.u32 %s2019_s21, 12 }
  0x44   : > { %s2572_s23 = scalar_select %p2185_p5, 1, 0 }
  0x45   : > { %s1533_s7 = sshll.u32 %s208_s30, 8  ;;  %s2198_s10 = scalar_lea.hbm %s2558_s0, %s1645_s6 }
  0x46   : > { %s212_s11 = scalar_lea.vmem [#allocation2], %s1533_s7  ;;  %p2202_p11 = pnand %p1677_p7, %p38_p9 }
  0x47   : > { %s220_s28 = sshll.u32 %s212_s11, 4  ;;  %s2206_s13 = scalar_lea.sflag [#allocation3], %s208_s30  ;;  %s2200_s28 = int_to_ptr.vmem [resolvable:$true] %s220_s28 }
  0x48   : > { %s1919_s14 = scalar_lea.hbm %s2198_s10, 4096  ;;  %p1921_p0 = pneg %p2202_p11 }
  0x49   : > { %p1920_p12 = scmp.ne.s32.totalorder %s2198_s10, %s1919_s14  ;;  %s1924_s6 = scalar_lea.hbm %s2558_s0, 8192 }
  0x4a   : > { %p1925_p13 = scmp.lt.u32.totalorder %s2198_s10, %s2558_s0  ;;  %p1926_p6 = scmp.lt.u32.totalorder %s1924_s6, %s1919_s14 }
  0x4b   : > { %p1922_p1 = pnand %p1921_p0, %p1920_p12  ;;  %p1928_p3 = scmp.lt.u32.totalorder %s1919_s14, %s2198_s10 }
  0x4c   : > { %p1927_p10 = por %p1926_p6, %p1925_p13 }
  0x4d   : > { %p1923_p2 = pneg %p1922_p1 }
  0x4e   : > { %p1929_p7 = por %p1928_p3, %p1927_p10 }
  0x50   : > { %p1930_p9 = pnand %p1929_p7, %p1923_p2 }
  0x52   : > { %1933 = shalt.err (!%p1930_p9)
}
  0x53   : > { %s1934_s30 = scalar_lea.vmem %s2200_s28, 4096  ;;  %s2025_s11 = smov [#allocation2]  }
  0x54   : > { %p1935_p12 = scmp.ne.s32.totalorder %s2200_s28, %s1934_s30  ;;  %s1939_s17 = sshll.u32 %s2025_s11, 4  ;;  %s1940_s17 = int_to_ptr.vmem [resolvable:$false] %s1939_s17 }
  0x55   : > { %s1941_s7 = scalar_lea.vmem %s1940_s17, 8192  ;;  %p1942_p4 = scmp.lt.s32.totalorder %s2200_s28, %s1940_s17 }
  0x56   : > { %p1937_p1 = pnand %p1935_p12, %p1921_p0  ;;  %p1943_p13 = scmp.lt.s32.totalorder %s1941_s7, %s1934_s30 }
  0x58   : > { %p1938_p5 = pneg %p1937_p1  ;;  %p1944_p6 = por %p1943_p13, %p1942_p4 }
  0x5a   : > { %p1945_p10 = pnand %p1944_p6, %p1938_p5 }
  0x5c   : > { %1948 = shalt.err (!%p1945_p10)
}
  0x5d   : > { %1670 = dma.hbm_to_vmem [thread:$0]  (!%p2202_p11), %s2198_s10, 4096, %s2200_s28, %s2206_s13, %s2023_s15, %s2023_s15, %s2024_s16  }
  0x5e   : > { %232 = sbr.rel (%p2099_p8) target bundleno = 808 (0x328), region = 40  ;;  %s2240_s14 = sand.u32 (!%p2099_p8), 1, %s2011_s19  }
  0x5f   : > { %s1538_s6 = sshll.u32 (!%p2099_p8), %s2240_s14, 8  ;;  %s235_s8 = scalar_lea.sflag (!%p2099_p8), [#allocation3], %s2240_s14 }
  0x60   : > { %s2244_s9 = scalar_lea.vmem (!%p2099_p8), [#allocation2], %s1538_s6  ;;  %p2574_p4 = scmp.ne.s32.totalorder (!%p2099_p8), %s2567_s24, 0 }
  0x65   : > { %1994 = dma.done.wait (%p2574_p4), %s235_s8, 4096  }
  0x66   : > { %1996 = vsyncadd (%p2574_p4), %s235_s8, 4294963200  ;;  %p2575_p5 = scmp.eq.s32.totalorder %s2080_s22, 0 }
  0x68   : > { %1998 = dma.done.wait (%p2575_p5), [#allocation6], 8192   ;;  %p2576_p8 = pmov %p2575_p5 }
  0x69   : > { %v1719_v0 = vld [vmem:[#allocation5 + $0x4] ss:$8 sps:$4 sm:$0xff]   ;;  %v1721_v1 = vld [vmem:[#allocation5] ss:$8 sps:$4 sm:$0xff]   ;;  %v1722_v2 = vld [vmem:[#allocation5 + $0x14] ss:$8 sps:$4 sm:$0xff]  }
  0x6a   : > { %2000 = vsyncadd (%p2576_p8), [#allocation6], 4294959104  ;;  %671 = vmatprep.subr.bf16.mxu0 %v1719_v0  ;;  %v1724_v3 = vld [vmem:[#allocation5 + $0x10] ss:$8 sps:$4 sm:$0xff]   ;;  %v1725_v4 = vld [vmem:[#allocation5 + $0x24] ss:$8 sps:$4 sm:$0xff]  }
  0x6b   : > { %672 = vmatpush1.bf16.xpose.msra.mxu0 %v1721_v1  ;;  %v1727_v5 = vld [vmem:[#allocation5 + $0x20] ss:$8 sps:$4 sm:$0xff]   ;;  %v1728_v6 = vld [vmem:[#allocation5 + $0x34] ss:$8 sps:$4 sm:$0xff]   ;;  %v1769_v7 = vld [vmem:[%s2244_s9 + $0x4] ss:$8 sps:$4 sm:$0xff]  }
  0x6c   : > { %673 = vmatprep.subr.bf16.mxu0 %v1722_v2  ;;  %v1730_v8 = vld [vmem:[#allocation5 + $0x30] ss:$8 sps:$4 sm:$0xff]   ;;  %v1731_v9 = vld [vmem:[#allocation5 + $0x44] ss:$8 sps:$4 sm:$0xff]   ;;  %703 = vmatprep.mubr.bf16.mxu0 %v1769_v7  ;;  %v1733_v10 = vld [vmem:[#allocation5 + $0x40] ss:$8 sps:$4 sm:$0xff]  }
  0x6d   : > { %v1734_v11 = vld [vmem:[#allocation5 + $0x54] ss:$8 sps:$4 sm:$0xff]   ;;  %v1736_v12 = vld [vmem:[#allocation5 + $0x50] ss:$8 sps:$4 sm:$0xff]   ;;  %v1737_v13 = vld [vmem:[#allocation5 + $0x64] ss:$8 sps:$4 sm:$0xff]  }
  0x6e   : > { %v1739_v14 = vld [vmem:[#allocation5 + $0x60] ss:$8 sps:$4 sm:$0xff]   ;;  %v1740_v15 = vld [vmem:[#allocation5 + $0x74] ss:$8 sps:$4 sm:$0xff]   ;;  %v1742_v16 = vld [vmem:[#allocation5 + $0x70] ss:$8 sps:$4 sm:$0xff]  }
  0x6f   : > { %v1743_v17 = vld [vmem:[#allocation5 + $0x84] ss:$8 sps:$4 sm:$0xff]   ;;  %v1745_v18 = vld [vmem:[#allocation5 + $0x80] ss:$8 sps:$4 sm:$0xff]   ;;  %v1746_v19 = vld [vmem:[#allocation5 + $0x94] ss:$8 sps:$4 sm:$0xff]  }
  0x70   : > { %v1748_v20 = vld [vmem:[#allocation5 + $0x90] ss:$8 sps:$4 sm:$0xff]   ;;  %v1749_v21 = vld [vmem:[#allocation5 + $0xa4] ss:$8 sps:$4 sm:$0xff]   ;;  %v1751_v22 = vld [vmem:[#allocation5 + $0xa0] ss:$8 sps:$4 sm:$0xff]  }
  0x71   : > { %v1752_v23 = vld [vmem:[#allocation5 + $0xb4] ss:$8 sps:$4 sm:$0xff]   ;;  %v1754_v24 = vld [vmem:[#allocation5 + $0xb0] ss:$8 sps:$4 sm:$0xff]   ;;  %v1755_v25 = vld [vmem:[#allocation5 + $0xc4] ss:$8 sps:$4 sm:$0xff]  }
  0x72   : > { %v1803_v26 = vld [vmem:[#allocation7 + $0x4] ss:$8 sps:$4 sm:$0xff]   ;;  %v1807_v27 = vld [vmem:[#allocation7] ss:$8 sps:$4 sm:$0xff]   ;;  %v1758_v29 = vld [vmem:[#allocation5 + $0xd4] ss:$8 sps:$4 sm:$0xff]  }
  0x73   : > { %674 = vmatpush1.bf16.xpose.msra.mxu0 %v1724_v3  ;;  %1164 = vmatprep.subr.bf16.mxu1 %v1803_v26  ;;  %v1757_v28 = vld [vmem:[#allocation5 + $0xc0] ss:$8 sps:$4 sm:$0xff]   ;;  %v1809_v30 = vld [vmem:[#allocation7 + $0x14] ss:$8 sps:$4 sm:$0xff]   ;;  %v1813_v31 = vld [vmem:[#allocation7 + $0x10] ss:$8 sps:$4 sm:$0xff]  }
  0x74   : > { %675 = vmatprep.subr.bf16.mxu0 %v1725_v4  ;;  %1165 = vmatpush1.bf16.xpose.msra.mxu1 %v1807_v27  ;;  %v1760_v32 = vld [vmem:[#allocation5 + $0xd0] ss:$8 sps:$4 sm:$0xff]   ;;  %v1761_v33 = vld [vmem:[#allocation5 + $0xe4] ss:$8 sps:$4 sm:$0xff]   ;;  %v1819_v35 = vld [vmem:[#allocation7 + $0x20] ss:$8 sps:$4 sm:$0xff]  }
  0x75   : > { %1166 = vmatprep.subr.bf16.mxu1 %v1809_v30  ;;  %v1815_v34 = vld [vmem:[#allocation7 + $0x24] ss:$8 sps:$4 sm:$0xff]   ;;  %v1763_v36 = vld [vmem:[#allocation5 + $0xe0] ss:$8 sps:$4 sm:$0xff]   ;;  %v1764_v37 = vld [vmem:[#allocation5 + $0xf4] ss:$8 sps:$4 sm:$0xff]  }
  0x76   : > { %v1821_v38 = vld [vmem:[#allocation7 + $0x34] ss:$8 sps:$4 sm:$0xff]   ;;  %v1825_v39 = vld [vmem:[#allocation7 + $0x30] ss:$8 sps:$4 sm:$0xff]   ;;  %v1827_v41 = vld [vmem:[#allocation7 + $0x44] ss:$8 sps:$4 sm:$0xff]  }
  0x77   : > { %v1766_v40 = vld [vmem:[#allocation5 + $0xf0] ss:$8 sps:$4 sm:$0xff]   ;;  %v1829_v42 = vld [vmem:[#allocation7 + $0x40] ss:$8 sps:$4 sm:$0xff]   ;;  %v1830_v43 = vld [vmem:[#allocation7 + $0x54] ss:$8 sps:$4 sm:$0xff]  }
  0x78   : > { %v1767_v44 = vld [vmem:[%s2244_s9] ss:$8 sps:$4 sm:$0xff]   ;;  %v1770_v45 = vld [vmem:[%s2244_s9 + $0x14] ss:$8 sps:$4 sm:$0xff]   ;;  %v1832_v46 = vld [vmem:[#allocation7 + $0x50] ss:$8 sps:$4 sm:$0xff]  }
  0x79   : > { %v1833_v47 = vld [vmem:[#allocation7 + $0x64] ss:$8 sps:$4 sm:$0xff]   ;;  %v1772_v48 = vld [vmem:[%s2244_s9 + $0x10] ss:$8 sps:$4 sm:$0xff]   ;;  %v1835_v50 = vld [vmem:[#allocation7 + $0x60] ss:$8 sps:$4 sm:$0xff]  }
  0x7a   : > { %v1773_v49 = vld [vmem:[%s2244_s9 + $0x24] ss:$8 sps:$4 sm:$0xff]   ;;  %v1836_v51 = vld [vmem:[#allocation7 + $0x74] ss:$8 sps:$4 sm:$0xff]   ;;  %v1775_v52 = vld [vmem:[%s2244_s9 + $0x20] ss:$8 sps:$4 sm:$0xff]  }
  0x7b   : > { %676 = vmatpush1.bf16.xpose.msra.mxu0 %v1727_v5  ;;  %v1776_v53 = vld [vmem:[%s2244_s9 + $0x34] ss:$8 sps:$4 sm:$0xff]   ;;  %v1838_v54 = vld [vmem:[#allocation7 + $0x70] ss:$8 sps:$4 sm:$0xff]   ;;  %v1839_v55 = vld [vmem:[#allocation7 + $0x84] ss:$8 sps:$4 sm:$0xff]  }
  0x7c   : > { %677 = vmatprep.subr.bf16.mxu0 %v1728_v6  ;;  %1167 = vmatpush1.bf16.xpose.msra.mxu1 %v1813_v31  ;;  %v1778_v56 = vld [vmem:[%s2244_s9 + $0x30] ss:$8 sps:$4 sm:$0xff]   ;;  %v1779_v57 = vld [vmem:[%s2244_s9 + $0x44] ss:$8 sps:$4 sm:$0xff]   ;;  %v1841_v58 = vld [vmem:[#allocation7 + $0x80] ss:$8 sps:$4 sm:$0xff]  }
  0x7d   : > { %1168 = vmatprep.subr.bf16.mxu1 %v1815_v34  ;;  %v1842_v59 = vld [vmem:[#allocation7 + $0x94] ss:$8 sps:$4 sm:$0xff]   ;;  %v1781_v60 = vld [vmem:[%s2244_s9 + $0x40] ss:$8 sps:$4 sm:$0xff]   ;;  %v1844_v62 = vld [vmem:[#allocation7 + $0x90] ss:$8 sps:$4 sm:$0xff]  }
  0x7e   : > { %v1782_v61 = vld [vmem:[%s2244_s9 + $0x54] ss:$8 sps:$4 sm:$0xff]   ;;  %v1845_v63 = vld [vmem:[#allocation7 + $0xa4] ss:$8 sps:$4 sm:$0xff]   ;;  %v1784_v0 = vld [vmem:[%s2244_s9 + $0x50] ss:$8 sps:$4 sm:$0xff]  }
  0x7f   : > { %v1785_v1 = vld [vmem:[%s2244_s9 + $0x64] ss:$8 sps:$4 sm:$0xff]   ;;  %v1847_v2 = vld [vmem:[#allocation7 + $0xa0] ss:$8 sps:$4 sm:$0xff]   ;;  %v1848_v3 = vld [vmem:[#allocation7 + $0xb4] ss:$8 sps:$4 sm:$0xff]  }
  0x80   : > { %v1787_v4 = vld [vmem:[%s2244_s9 + $0x60] ss:$8 sps:$4 sm:$0xff]   ;;  %v1788_v5 = vld [vmem:[%s2244_s9 + $0x74] ss:$8 sps:$4 sm:$0xff]   ;;  %v1850_v6 = vld [vmem:[#allocation7 + $0xb0] ss:$8 sps:$4 sm:$0xff]  }
  0x81   : > { %v1851_v7 = vld [vmem:[#allocation7 + $0xc4] ss:$8 sps:$4 sm:$0xff]   ;;  %v1811_v26 = vld [vmem:[%s2244_s9 + $0xd4] ss:$8 sps:$4 sm:$0xff]   ;;  %v1814_v27 = vld [vmem:[%s2244_s9 + $0xd0] ss:$8 sps:$4 sm:$0xff]  }
  0x82   : > { %v1823_v30 = vld [vmem:[%s2244_s9 + $0xf4] ss:$8 sps:$4 sm:$0xff]   ;;  %v1826_v31 = vld [vmem:[%s2244_s9 + $0xf0] ss:$8 sps:$4 sm:$0xff]   ;;  %s1541_s10 = sshll.u32 %s2240_s14, 9  ;;  %s1647_s12 = sshll.u32 %s2080_s22, 13 }
  0x83   : > { %678 = vmatpush1.bf16.xpose.msra.mxu0 %v1730_v8  ;;  %v1790_v8 = vld [vmem:[%s2244_s9 + $0x70] ss:$8 sps:$4 sm:$0xff]   ;;  %s2379_s28 = scalar_lea.vmem [#allocation8], %s1541_s10  ;;  %s2508_s17 = scalar_lea.hbm %s2563_s5, %s1647_s12 }
  0x84   : > { %679 = vmatprep.subr.bf16.mxu0 %v1731_v9  ;;  %1169 = vmatpush1.bf16.xpose.msra.mxu1 %v1819_v35  ;;  %v1791_v9 = vld [vmem:[%s2244_s9 + $0x84] ss:$8 sps:$4 sm:$0xff]   ;;  %v339_v35 = vld [vmem:[%s2560_s2] sm:$0x3]  ;;  %s1436_s13 = sshll.u32 %s2379_s28, 4  ;;  %s1422_s22 = scalar_lea.sflag [#allocation4], %s2240_s14  ;;  %s2510_s13 = int_to_ptr.vmem [resolvable:$true] %s1436_s13 }
  0x85   : > { %1170 = vmatprep.subr.bf16.mxu1 %v1821_v38  ;;  %s1949_s7 = scalar_lea.vmem %s2510_s13, 8192  ;;  %p2577_p0 = scmp.ne.s32.totalorder %s2572_s23, 0 }
  0x86   : > { %p1950_p11 = scmp.ne.s32.totalorder %s2510_s13, %s1949_s7  ;;  %s2026_s6 = smov [#allocation8]  }
  0x87   : > { %s1953_s8 = sshll.u32 %s2026_s6, 4  ;;  %s1954_s8 = int_to_ptr.vmem [resolvable:$false] %s1953_s8 }
  0x88   : > { %p1951_p2 = pnand %p1950_p11, %p2577_p0  ;;  %p1956_p7 = scmp.lt.s32.totalorder %s2510_s13, %s1954_s8 }
  0x8a   : > { %p1952_p3 = pneg %p1951_p2 }
  0x8b   : > { %680 = vmatpush1.bf16.xpose.msra.mxu0 %v1733_v10  ;;  %v1853_v10 = vld [vmem:[#allocation7 + $0xc0] ss:$8 sps:$4 sm:$0xff]  }
  0x8c   : > { %681 = vmatprep.subr.bf16.mxu0 %v1734_v11  ;;  %1171 = vmatpush1.bf16.xpose.msra.mxu1 %v1825_v39  ;;  %v1854_v11 = vld [vmem:[#allocation7 + $0xd4] ss:$8 sps:$4 sm:$0xff]  }
  0x8d   : > { %1172 = vmatprep.subr.bf16.mxu1 %v1827_v41 }
  0x93   : > { %682 = vmatpush1.bf16.xpose.msra.mxu0 %v1736_v12  ;;  %v1793_v12 = vld [vmem:[%s2244_s9 + $0x80] ss:$8 sps:$4 sm:$0xff]  }
  0x94   : > { %683 = vmatprep.subr.bf16.mxu0 %v1737_v13  ;;  %1173 = vmatpush1.bf16.xpose.msra.mxu1 %v1829_v42  ;;  %v1794_v13 = vld [vmem:[%s2244_s9 + $0x94] ss:$8 sps:$4 sm:$0xff]  }
  0x95   : > { %1174 = vmatprep.subr.bf16.mxu1 %v1830_v43 }
  0x9b   : > { %684 = vmatpush1.bf16.xpose.msra.mxu0 %v1739_v14  ;;  %v1856_v14 = vld [vmem:[#allocation7 + $0xd0] ss:$8 sps:$4 sm:$0xff]  }
  0x9c   : > { %685 = vmatprep.subr.bf16.mxu0 %v1740_v15  ;;  %1175 = vmatpush1.bf16.xpose.msra.mxu1 %v1832_v46  ;;  %v1857_v15 = vld [vmem:[#allocation7 + $0xe4] ss:$8 sps:$4 sm:$0xff]  }
  0x9d   : > { %1176 = vmatprep.subr.bf16.mxu1 %v1833_v47 }
  0xa3   : > { %686 = vmatpush1.bf16.xpose.msra.mxu0 %v1742_v16  ;;  %v1796_v16 = vld [vmem:[%s2244_s9 + $0x90] ss:$8 sps:$4 sm:$0xff]  }
  0xa4   : > { %687 = vmatprep.subr.bf16.mxu0 %v1743_v17  ;;  %1177 = vmatpush1.bf16.xpose.msra.mxu1 %v1835_v50  ;;  %v1797_v17 = vld [vmem:[%s2244_s9 + $0xa4] ss:$8 sps:$4 sm:$0xff]  }
  0xa5   : > { %1178 = vmatprep.subr.bf16.mxu1 %v1836_v51 }
  0xab   : > { %688 = vmatpush1.bf16.xpose.msra.mxu0 %v1745_v18  ;;  %v1859_v18 = vld [vmem:[#allocation7 + $0xe0] ss:$8 sps:$4 sm:$0xff]  }
  0xac   : > { %689 = vmatprep.subr.bf16.mxu0 %v1746_v19  ;;  %1179 = vmatpush1.bf16.xpose.msra.mxu1 %v1838_v54  ;;  %v1799_v19 = vld [vmem:[%s2244_s9 + $0xa0] ss:$8 sps:$4 sm:$0xff]  }
  0xad   : > { %1180 = vmatprep.subr.bf16.mxu1 %v1839_v55 }
  0xb3   : > { %690 = vmatpush1.bf16.xpose.msra.mxu0 %v1748_v20  ;;  %v1800_v20 = vld [vmem:[%s2244_s9 + $0xb4] ss:$8 sps:$4 sm:$0xff]  }
  0xb4   : > { %691 = vmatprep.subr.bf16.mxu0 %v1749_v21  ;;  %1181 = vmatpush1.bf16.xpose.msra.mxu1 %v1841_v58  ;;  %v1802_v21 = vld [vmem:[%s2244_s9 + $0xb0] ss:$8 sps:$4 sm:$0xff]  }
  0xb5   : > { %1182 = vmatprep.subr.bf16.mxu1 %v1842_v59 }
  0xbb   : > { %692 = vmatpush1.bf16.xpose.msra.mxu0 %v1751_v22  ;;  %v1860_v22 = vld [vmem:[#allocation7 + $0xf4] ss:$8 sps:$4 sm:$0xff]  }
  0xbc   : > { %693 = vmatprep.subr.bf16.mxu0 %v1752_v23  ;;  %1183 = vmatpush1.bf16.xpose.msra.mxu1 %v1844_v62  ;;  %v1805_v23 = vld [vmem:[%s2244_s9 + $0xc4] ss:$8 sps:$4 sm:$0xff]  }
  0xbd   : > { %1184 = vmatprep.subr.bf16.mxu1 %v1845_v63 }
  0xc3   : > { %694 = vmatpush1.bf16.xpose.msra.mxu0 %v1754_v24  ;;  %v1862_v24 = vld [vmem:[#allocation7 + $0xf0] ss:$8 sps:$4 sm:$0xff]  }
  0xc4   : > { %695 = vmatprep.subr.bf16.mxu0 %v1755_v25  ;;  %1185 = vmatpush1.bf16.xpose.msra.mxu1 %v1847_v2  ;;  %v1808_v25 = vld [vmem:[%s2244_s9 + $0xc0] ss:$8 sps:$4 sm:$0xff]  }
  0xc5   : > { %1186 = vmatprep.subr.bf16.mxu1 %v1848_v3 }
  0xcb   : > { %696 = vmatpush1.bf16.xpose.msra.mxu0 %v1757_v28  ;;  %v1817_v28 = vld [vmem:[%s2244_s9 + $0xe4] ss:$8 sps:$4 sm:$0xff]  }
  0xcc   : > { %697 = vmatprep.subr.bf16.mxu0 %v1758_v29  ;;  %1187 = vmatpush1.bf16.xpose.msra.mxu1 %v1850_v6  ;;  %v1820_v29 = vld [vmem:[%s2244_s9 + $0xe0] ss:$8 sps:$4 sm:$0xff]   ;;  %s1955_s9 = scalar_lea.vmem %s1954_s8, 16384 }
  0xcd   : > { %1188 = vmatprep.subr.bf16.mxu1 %v1851_v7  ;;  %p1957_p9 = scmp.lt.s32.totalorder %s1955_s9, %s1949_s7 }
  0xcf   : > { %p1958_p12 = por %p1957_p9, %p1956_p7 }
  0xd1   : > { %p1959_p1 = pnand %p1958_p12, %p1952_p3 }
  0xd3   : > { %698 = vmatpush1.bf16.xpose.msra.mxu0 %v1760_v32  ;;  %v341_v32 = vlaneseq }
  0xd4   : > { %699 = vmatprep.subr.bf16.mxu0 %v1761_v33  ;;  %1189 = vmatpush1.bf16.xpose.msra.mxu1 %v1853_v10 }
  0xd5   : > { %1190 = vmatprep.subr.bf16.mxu1 %v1854_v11  ;;  %v2286_v33 = vshrl.u32 %v341_v32, 7 }
  0xd7   : > { %v343_v34 = vsub.s32 0, %v2286_v33 }
  0xdb   : > { %700 = vmatpush1.bf16.xpose.msra.mxu0 %v1763_v36  ;;  %v347_v36 = vsub.s32 1, %v2286_v33 }
  0xdc   : > { %701 = vmatprep.subr.bf16.mxu0 %v1764_v37  ;;  %1191 = vmatpush1.bf16.xpose.msra.mxu1 %v1856_v14  ;;  %v2295_v37 = vrot.slane %v339_v35, %v343_v34 }
  0xdd   : > { %1192 = vmatprep.subr.bf16.mxu1 %v1857_v15  ;;  %v2299_v38 = vrot.slane %v339_v35, %v347_v36 }
  0xe3   : > { %702 = vmatpush1.bf16.xpose.msra.mxu0 %v1766_v40 }
  0xe4   : > { %1193 = vmatpush1.bf16.xpose.msra.mxu1 %v1859_v18 }
  0xe5   : > { %1194 = vmatprep.subr.bf16.mxu1 %v1860_v22 }
  0xea   : > { %704 = vmatmul.mubr.bf16.vlgmr.msra.gmra.mrb[0].mxu0 %v1767_v44 }
  0xeb   : > { %713 = vmatprep.mubr.bf16.mxu0 %v1770_v45 }
  0xec   : > { %1195 = vmatpush1.bf16.xpose.msra.mxu1 %v1862_v24 }
  0xf2   : > { %714 = vmatmul.mubr.bf16.gmra.mrb[4].mxu0 %v1772_v48 }
  0xf3   : > { %723 = vmatprep.mubr.bf16.mxu0 %v1773_v49 }
  0xfa   : > { %724 = vmatmul.mubr.bf16.gmra.mrb[8].mxu0 %v1775_v52 }
  0xfb   : > { %733 = vmatprep.mubr.bf16.mxu0 %v1776_v53 }
 0x102   : > { %734 = vmatmul.mubr.bf16.gmra.mrb[12].mxu0 %v1778_v56 }
 0x103   : > { %743 = vmatprep.mubr.bf16.mxu0 %v1779_v57 }
 0x10a   : > { %744 = vmatmul.mubr.bf16.gmra.mrb[16].mxu0 %v1781_v60 }
 0x10b   : > { %753 = vmatprep.mubr.bf16.mxu0 %v1782_v61 }
 0x112   : > { %754 = vmatmul.mubr.bf16.gmra.mrb[20].mxu0 %v1784_v0 }
 0x113   : > { %763 = vmatprep.mubr.bf16.mxu0 %v1785_v1 }
 0x11a   : > { %764 = vmatmul.mubr.bf16.gmra.mrb[24].mxu0 %v1787_v4 }
 0x11b   : > { %773 = vmatprep.mubr.bf16.mxu0 %v1788_v5 }
 0x122   : > { %774 = vmatmul.mubr.bf16.gmra.mrb[28].mxu0 %v1790_v8 }
 0x123   : > { %783 = vmatprep.mubr.bf16.mxu0 %v1791_v9 }
 0x12a   : > { %784 = vmatmul.mubr.bf16.gmra.mrb[32].mxu0 %v1793_v12 }
 0x12b   : > { %793 = vmatprep.mubr.bf16.mxu0 %v1794_v13 }
 0x132   : > { %794 = vmatmul.mubr.bf16.gmra.mrb[36].mxu0 %v1796_v16 }
 0x133   : > { %803 = vmatprep.mubr.bf16.mxu0 %v1797_v17 }
 0x13a   : > { %804 = vmatmul.mubr.bf16.gmra.mrb[40].mxu0 %v1799_v19 }
 0x13b   : > { %813 = vmatprep.mubr.bf16.mxu0 %v1800_v20 }
 0x142   : > { %814 = vmatmul.mubr.bf16.gmra.mrb[44].mxu0 %v1802_v21 }
 0x143   : > { %823 = vmatprep.mubr.bf16.mxu0 %v1805_v23 }
 0x14a   : > { %824 = vmatmul.mubr.bf16.gmra.mrb[48].mxu0 %v1808_v25 }
 0x14b   : > { %833 = vmatprep.mubr.bf16.mxu0 %v1811_v26 }
 0x152   : > { %834 = vmatmul.mubr.bf16.gmra.mrb[52].mxu0 %v1814_v27 }
 0x153   : > { %843 = vmatprep.mubr.bf16.mxu0 %v1817_v28 }
 0x15a   : > { %844 = vmatmul.mubr.bf16.gmra.mrb[56].mxu0 %v1820_v29 }
 0x15b   : > { %853 = vmatprep.mubr.bf16.mxu0 %v1823_v30 }
 0x162   : > { %854 = vmatmul.mubr.bf16.gmra.mrb[60].mxu0 %v1826_v31 }
 0x1bd   : > { %v705_v39 = vpop.f32.mrb[0].mxu0 }
 0x1be   : > { %v706_v40 = vadd.f32 %v705_v39, %v2295_v37  ;;  %v707_v41 = vpop.f32.mrb[1].mxu0 }
 0x1bf   : > { %v708_v42 = vadd.f32 %v707_v41, %v2299_v38  ;;  %v709_v43 = vpop.f32.mrb[2].mxu0 }
 0x1c0   : > { %v710_v44 = vadd.f32 %v709_v43, %v2295_v37  ;;  %v711_v45 = vpop.f32.mrb[3].mxu0  ;;  %v864_v47 = vmax.f32 %v706_v40, 0.0 }
 0x1c1   : > { %v712_v46 = vadd.f32 %v711_v45, %v2299_v38  ;;  %v865_v49 = vmax.f32 %v708_v42, 0.0 }
 0x1c2   : > { %v866_v48 = vmax.f32 %v710_v44, 0.0 }
 0x1c3   : > { %v867_v50 = vmax.f32 %v712_v46, 0.0 }
 0x1c4   : > { %v928_v51 = vpack.c.bf16 %v866_v48, %v864_v47 }
 0x1c5   : > { %v715_v52 = vpop.f32.mrb[4].mxu0  ;;  %v929_v53 = vpack.c.bf16 %v867_v50, %v865_v49 }
 0x1c6   : > { %v716_v54 = vadd.f32 %v715_v52, %v2295_v37  ;;  %v717_v55 = vpop.f32.mrb[5].mxu0 }
 0x1c7   : > { %v718_v56 = vadd.f32 %v717_v55, %v2299_v38  ;;  %v719_v57 = vpop.f32.mrb[6].mxu0  ;;  %1196 = vmatprep.mubr.bf16.mxu1 %v929_v53 }
 0x1c8   : > { %v720_v58 = vadd.f32 %v719_v57, %v2295_v37  ;;  %v721_v59 = vpop.f32.mrb[7].mxu0  ;;  %1197 = vmatmul.mubr.bf16.vlgmr.msra.gmra.mrb[0].mxu1 %v928_v51  ;;  %v868_v61 = vmax.f32 %v716_v54, 0.0 }
 0x1c9   : > { %v722_v60 = vadd.f32 %v721_v59, %v2299_v38  ;;  %v869_v63 = vmax.f32 %v718_v56, 0.0 }
 0x1ca   : > { %v870_v62 = vmax.f32 %v720_v58, 0.0 }
 0x1cb   : > { %v871_v0 = vmax.f32 %v722_v60, 0.0 }
 0x1cc   : > { %v930_v1 = vpack.c.bf16 %v870_v62, %v868_v61 }
 0x1cd   : > { %v931_v2 = vpack.c.bf16 %v871_v0, %v869_v63  ;;  %v725_v3 = vpop.f32.mrb[8].mxu0 }
 0x1ce   : > { %v726_v4 = vadd.f32 %v725_v3, %v2295_v37  ;;  %v727_v5 = vpop.f32.mrb[9].mxu0 }
 0x1cf   : > { %v728_v6 = vadd.f32 %v727_v5, %v2299_v38  ;;  %v729_v7 = vpop.f32.mrb[10].mxu0  ;;  %1206 = vmatprep.mubr.bf16.mxu1 %v931_v2 }
 0x1d0   : > { %v730_v8 = vadd.f32 %v729_v7, %v2295_v37  ;;  %v731_v9 = vpop.f32.mrb[11].mxu0  ;;  %1207 = vmatmul.mubr.bf16.gmra.mrb[4].mxu1 %v930_v1  ;;  %v872_v11 = vmax.f32 %v726_v4, 0.0 }
 0x1d1   : > { %v732_v10 = vadd.f32 %v731_v9, %v2299_v38  ;;  %v873_v13 = vmax.f32 %v728_v6, 0.0 }
 0x1d2   : > { %v874_v12 = vmax.f32 %v730_v8, 0.0 }
 0x1d3   : > { %v875_v14 = vmax.f32 %v732_v10, 0.0 }
 0x1d4   : > { %v932_v15 = vpack.c.bf16 %v874_v12, %v872_v11 }
 0x1d5   : > { %v933_v16 = vpack.c.bf16 %v875_v14, %v873_v13  ;;  %v735_v17 = vpop.f32.mrb[12].mxu0 }
 0x1d6   : > { %v736_v18 = vadd.f32 %v735_v17, %v2295_v37  ;;  %v737_v19 = vpop.f32.mrb[13].mxu0 }
 0x1d7   : > { %v738_v20 = vadd.f32 %v737_v19, %v2299_v38  ;;  %v739_v21 = vpop.f32.mrb[14].mxu0  ;;  %1216 = vmatprep.mubr.bf16.mxu1 %v933_v16 }
 0x1d8   : > { %v740_v22 = vadd.f32 %v739_v21, %v2295_v37  ;;  %v741_v23 = vpop.f32.mrb[15].mxu0  ;;  %1217 = vmatmul.mubr.bf16.gmra.mrb[8].mxu1 %v932_v15  ;;  %v876_v25 = vmax.f32 %v736_v18, 0.0 }
 0x1d9   : > { %v742_v24 = vadd.f32 %v741_v23, %v2299_v38  ;;  %v877_v27 = vmax.f32 %v738_v20, 0.0 }
 0x1da   : > { %v878_v26 = vmax.f32 %v740_v22, 0.0 }
 0x1db   : > { %v879_v28 = vmax.f32 %v742_v24, 0.0 }
 0x1dc   : > { %v934_v29 = vpack.c.bf16 %v878_v26, %v876_v25 }
 0x1dd   : > { %v935_v30 = vpack.c.bf16 %v879_v28, %v877_v27  ;;  %v745_v31 = vpop.f32.mrb[16].mxu0 }
 0x1de   : > { %v746_v32 = vadd.f32 %v745_v31, %v2295_v37  ;;  %v747_v35 = vpop.f32.mrb[17].mxu0 }
 0x1df   : > { %v748_v39 = vadd.f32 %v747_v35, %v2299_v38  ;;  %v749_v40 = vpop.f32.mrb[18].mxu0  ;;  %1226 = vmatprep.mubr.bf16.mxu1 %v935_v30 }
 0x1e0   : > { %v750_v41 = vadd.f32 %v749_v40, %v2295_v37  ;;  %v751_v42 = vpop.f32.mrb[19].mxu0  ;;  %1227 = vmatmul.mubr.bf16.gmra.mrb[12].mxu1 %v934_v29  ;;  %v880_v44 = vmax.f32 %v746_v32, 0.0 }
 0x1e1   : > { %v752_v43 = vadd.f32 %v751_v42, %v2299_v38  ;;  %v881_v46 = vmax.f32 %v748_v39, 0.0 }
 0x1e2   : > { %v882_v45 = vmax.f32 %v750_v41, 0.0 }
 0x1e3   : > { %v883_v47 = vmax.f32 %v752_v43, 0.0 }
 0x1e4   : > { %v936_v48 = vpack.c.bf16 %v882_v45, %v880_v44 }
 0x1e5   : > { %v937_v49 = vpack.c.bf16 %v883_v47, %v881_v46  ;;  %v755_v50 = vpop.f32.mrb[20].mxu0 }
 0x1e6   : > { %v756_v51 = vadd.f32 %v755_v50, %v2295_v37  ;;  %v757_v52 = vpop.f32.mrb[21].mxu0 }
 0x1e7   : > { %v758_v53 = vadd.f32 %v757_v52, %v2299_v38  ;;  %v759_v54 = vpop.f32.mrb[22].mxu0  ;;  %1236 = vmatprep.mubr.bf16.mxu1 %v937_v49 }
 0x1e8   : > { %v760_v55 = vadd.f32 %v759_v54, %v2295_v37  ;;  %v761_v56 = vpop.f32.mrb[23].mxu0  ;;  %1237 = vmatmul.mubr.bf16.gmra.mrb[16].mxu1 %v936_v48  ;;  %v884_v58 = vmax.f32 %v756_v51, 0.0 }
 0x1e9   : > { %v762_v57 = vadd.f32 %v761_v56, %v2299_v38  ;;  %v885_v60 = vmax.f32 %v758_v53, 0.0 }
 0x1ea   : > { %v886_v59 = vmax.f32 %v760_v55, 0.0 }
 0x1eb   : > { %v887_v61 = vmax.f32 %v762_v57, 0.0 }
 0x1ec   : > { %v938_v62 = vpack.c.bf16 %v886_v59, %v884_v58 }
 0x1ed   : > { %v939_v63 = vpack.c.bf16 %v887_v61, %v885_v60  ;;  %v765_v0 = vpop.f32.mrb[24].mxu0 }
 0x1ee   : > { %v766_v1 = vadd.f32 %v765_v0, %v2295_v37  ;;  %v767_v2 = vpop.f32.mrb[25].mxu0 }
 0x1ef   : > { %v768_v3 = vadd.f32 %v767_v2, %v2299_v38  ;;  %v769_v4 = vpop.f32.mrb[26].mxu0  ;;  %1246 = vmatprep.mubr.bf16.mxu1 %v939_v63 }
 0x1f0   : > { %v770_v5 = vadd.f32 %v769_v4, %v2295_v37  ;;  %v771_v6 = vpop.f32.mrb[27].mxu0  ;;  %1247 = vmatmul.mubr.bf16.gmra.mrb[20].mxu1 %v938_v62  ;;  %v888_v8 = vmax.f32 %v766_v1, 0.0 }
 0x1f1   : > { %v772_v7 = vadd.f32 %v771_v6, %v2299_v38  ;;  %v889_v10 = vmax.f32 %v768_v3, 0.0 }
 0x1f2   : > { %v890_v9 = vmax.f32 %v770_v5, 0.0 }
 0x1f3   : > { %v891_v11 = vmax.f32 %v772_v7, 0.0 }
 0x1f4   : > { %v940_v12 = vpack.c.bf16 %v890_v9, %v888_v8 }
 0x1f5   : > { %v941_v13 = vpack.c.bf16 %v891_v11, %v889_v10  ;;  %v775_v14 = vpop.f32.mrb[28].mxu0 }
 0x1f6   : > { %v776_v15 = vadd.f32 %v775_v14, %v2295_v37  ;;  %v777_v16 = vpop.f32.mrb[29].mxu0 }
 0x1f7   : > { %v778_v17 = vadd.f32 %v777_v16, %v2299_v38  ;;  %v779_v18 = vpop.f32.mrb[30].mxu0  ;;  %1256 = vmatprep.mubr.bf16.mxu1 %v941_v13 }
 0x1f8   : > { %v780_v19 = vadd.f32 %v779_v18, %v2295_v37  ;;  %v781_v20 = vpop.f32.mrb[31].mxu0  ;;  %1257 = vmatmul.mubr.bf16.gmra.mrb[24].mxu1 %v940_v12  ;;  %v892_v22 = vmax.f32 %v776_v15, 0.0 }
 0x1f9   : > { %v782_v21 = vadd.f32 %v781_v20, %v2299_v38  ;;  %v893_v24 = vmax.f32 %v778_v17, 0.0 }
 0x1fa   : > { %v894_v23 = vmax.f32 %v780_v19, 0.0 }
 0x1fb   : > { %v895_v25 = vmax.f32 %v782_v21, 0.0 }
 0x1fc   : > { %v942_v26 = vpack.c.bf16 %v894_v23, %v892_v22 }
 0x1fd   : > { %v943_v27 = vpack.c.bf16 %v895_v25, %v893_v24  ;;  %v785_v28 = vpop.f32.mrb[32].mxu0 }
 0x1fe   : > { %v786_v29 = vadd.f32 %v785_v28, %v2295_v37  ;;  %v787_v30 = vpop.f32.mrb[33].mxu0 }
 0x1ff   : > { %v788_v31 = vadd.f32 %v787_v30, %v2299_v38  ;;  %v789_v32 = vpop.f32.mrb[34].mxu0  ;;  %1266 = vmatprep.mubr.bf16.mxu1 %v943_v27 }
 0x200   : > { %v790_v35 = vadd.f32 %v789_v32, %v2295_v37  ;;  %v791_v39 = vpop.f32.mrb[35].mxu0  ;;  %1267 = vmatmul.mubr.bf16.gmra.mrb[28].mxu1 %v942_v26  ;;  %v896_v41 = vmax.f32 %v786_v29, 0.0 }
 0x201   : > { %v792_v40 = vadd.f32 %v791_v39, %v2299_v38  ;;  %v897_v43 = vmax.f32 %v788_v31, 0.0 }
 0x202   : > { %v898_v42 = vmax.f32 %v790_v35, 0.0 }
 0x203   : > { %v899_v44 = vmax.f32 %v792_v40, 0.0 }
 0x204   : > { %v944_v45 = vpack.c.bf16 %v898_v42, %v896_v41 }
 0x205   : > { %v945_v46 = vpack.c.bf16 %v899_v44, %v897_v43  ;;  %v795_v47 = vpop.f32.mrb[36].mxu0 }
 0x206   : > { %v796_v48 = vadd.f32 %v795_v47, %v2295_v37  ;;  %v797_v49 = vpop.f32.mrb[37].mxu0 }
 0x207   : > { %v798_v50 = vadd.f32 %v797_v49, %v2299_v38  ;;  %v799_v51 = vpop.f32.mrb[38].mxu0  ;;  %1276 = vmatprep.mubr.bf16.mxu1 %v945_v46 }
 0x208   : > { %v800_v52 = vadd.f32 %v799_v51, %v2295_v37  ;;  %v801_v53 = vpop.f32.mrb[39].mxu0  ;;  %1277 = vmatmul.mubr.bf16.gmra.mrb[32].mxu1 %v944_v45  ;;  %v900_v55 = vmax.f32 %v796_v48, 0.0 }
 0x209   : > { %v802_v54 = vadd.f32 %v801_v53, %v2299_v38  ;;  %v901_v57 = vmax.f32 %v798_v50, 0.0 }
 0x20a   : > { %v902_v56 = vmax.f32 %v800_v52, 0.0 }
 0x20b   : > { %v903_v58 = vmax.f32 %v802_v54, 0.0 }
 0x20c   : > { %v946_v59 = vpack.c.bf16 %v902_v56, %v900_v55 }
 0x20d   : > { %v947_v60 = vpack.c.bf16 %v903_v58, %v901_v57  ;;  %v805_v61 = vpop.f32.mrb[40].mxu0 }
 0x20e   : > { %v806_v62 = vadd.f32 %v805_v61, %v2295_v37  ;;  %v807_v63 = vpop.f32.mrb[41].mxu0 }
 0x20f   : > { %v808_v0 = vadd.f32 %v807_v63, %v2299_v38  ;;  %v809_v1 = vpop.f32.mrb[42].mxu0  ;;  %1286 = vmatprep.mubr.bf16.mxu1 %v947_v60 }
 0x210   : > { %v810_v2 = vadd.f32 %v809_v1, %v2295_v37  ;;  %v811_v3 = vpop.f32.mrb[43].mxu0  ;;  %1287 = vmatmul.mubr.bf16.gmra.mrb[36].mxu1 %v946_v59  ;;  %v904_v5 = vmax.f32 %v806_v62, 0.0 }
 0x211   : > { %v812_v4 = vadd.f32 %v811_v3, %v2299_v38  ;;  %v905_v7 = vmax.f32 %v808_v0, 0.0 }
 0x212   : > { %v906_v6 = vmax.f32 %v810_v2, 0.0 }
 0x213   : > { %v907_v8 = vmax.f32 %v812_v4, 0.0 }
 0x214   : > { %v948_v9 = vpack.c.bf16 %v906_v6, %v904_v5 }
 0x215   : > { %v949_v10 = vpack.c.bf16 %v907_v8, %v905_v7  ;;  %v815_v11 = vpop.f32.mrb[44].mxu0 }
 0x216   : > { %v816_v12 = vadd.f32 %v815_v11, %v2295_v37  ;;  %v817_v13 = vpop.f32.mrb[45].mxu0 }
 0x217   : > { %v818_v14 = vadd.f32 %v817_v13, %v2299_v38  ;;  %v819_v15 = vpop.f32.mrb[46].mxu0  ;;  %1296 = vmatprep.mubr.bf16.mxu1 %v949_v10 }
 0x218   : > { %v820_v16 = vadd.f32 %v819_v15, %v2295_v37  ;;  %v821_v17 = vpop.f32.mrb[47].mxu0  ;;  %1297 = vmatmul.mubr.bf16.gmra.mrb[40].mxu1 %v948_v9  ;;  %v908_v19 = vmax.f32 %v816_v12, 0.0 }
 0x219   : > { %v822_v18 = vadd.f32 %v821_v17, %v2299_v38  ;;  %v909_v21 = vmax.f32 %v818_v14, 0.0 }
 0x21a   : > { %v910_v20 = vmax.f32 %v820_v16, 0.0 }
 0x21b   : > { %v911_v22 = vmax.f32 %v822_v18, 0.0 }
 0x21c   : > { %v950_v23 = vpack.c.bf16 %v910_v20, %v908_v19 }
 0x21d   : > { %v951_v24 = vpack.c.bf16 %v911_v22, %v909_v21  ;;  %v825_v25 = vpop.f32.mrb[48].mxu0  ;;  %v992_v22 = vld [vmem:[%s2562_s4] sm:$0x3] }
 0x21e   : > { %v826_v26 = vadd.f32 %v825_v25, %v2295_v37  ;;  %v827_v27 = vpop.f32.mrb[49].mxu0 }
 0x21f   : > { %v828_v28 = vadd.f32 %v827_v27, %v2299_v38  ;;  %v829_v29 = vpop.f32.mrb[50].mxu0  ;;  %1306 = vmatprep.mubr.bf16.mxu1 %v951_v24 }
 0x220   : > { %v830_v30 = vadd.f32 %v829_v29, %v2295_v37  ;;  %v831_v31 = vpop.f32.mrb[51].mxu0  ;;  %1307 = vmatmul.mubr.bf16.gmra.mrb[44].mxu1 %v950_v23  ;;  %v912_v35 = vmax.f32 %v826_v26, 0.0 }
 0x221   : > { %v832_v32 = vadd.f32 %v831_v31, %v2299_v38  ;;  %v913_v40 = vmax.f32 %v828_v28, 0.0 }
 0x222   : > { %v914_v39 = vmax.f32 %v830_v30, 0.0 }
 0x223   : > { %v915_v41 = vmax.f32 %v832_v32, 0.0 }
 0x224   : > { %v952_v42 = vpack.c.bf16 %v914_v39, %v912_v35 }
 0x225   : > { %v953_v43 = vpack.c.bf16 %v915_v41, %v913_v40  ;;  %v835_v44 = vpop.f32.mrb[52].mxu0 }
 0x226   : > { %v836_v45 = vadd.f32 %v835_v44, %v2295_v37  ;;  %v837_v46 = vpop.f32.mrb[53].mxu0 }
 0x227   : > { %v838_v47 = vadd.f32 %v837_v46, %v2299_v38  ;;  %v839_v48 = vpop.f32.mrb[54].mxu0  ;;  %1316 = vmatprep.mubr.bf16.mxu1 %v953_v43 }
 0x228   : > { %v840_v49 = vadd.f32 %v839_v48, %v2295_v37  ;;  %v841_v50 = vpop.f32.mrb[55].mxu0  ;;  %1317 = vmatmul.mubr.bf16.gmra.mrb[48].mxu1 %v952_v42  ;;  %v916_v52 = vmax.f32 %v836_v45, 0.0 }
 0x229   : > { %v842_v51 = vadd.f32 %v841_v50, %v2299_v38  ;;  %v917_v54 = vmax.f32 %v838_v47, 0.0 }
 0x22a   : > { %v918_v53 = vmax.f32 %v840_v49, 0.0 }
 0x22b   : > { %v919_v55 = vmax.f32 %v842_v51, 0.0 }
 0x22c   : > { %v954_v56 = vpack.c.bf16 %v918_v53, %v916_v52 }
 0x22d   : > { %v955_v57 = vpack.c.bf16 %v919_v55, %v917_v54  ;;  %v845_v58 = vpop.f32.mrb[56].mxu0 }
 0x22e   : > { %v846_v59 = vadd.f32 %v845_v58, %v2295_v37  ;;  %v847_v60 = vpop.f32.mrb[57].mxu0 }
 0x22f   : > { %v848_v61 = vadd.f32 %v847_v60, %v2299_v38  ;;  %v849_v62 = vpop.f32.mrb[58].mxu0  ;;  %1326 = vmatprep.mubr.bf16.mxu1 %v955_v57 }
 0x230   : > { %v850_v63 = vadd.f32 %v849_v62, %v2295_v37  ;;  %v851_v0 = vpop.f32.mrb[59].mxu0  ;;  %1327 = vmatmul.mubr.bf16.gmra.mrb[52].mxu1 %v954_v56  ;;  %v920_v2 = vmax.f32 %v846_v59, 0.0 }
 0x231   : > { %v852_v1 = vadd.f32 %v851_v0, %v2299_v38  ;;  %v921_v4 = vmax.f32 %v848_v61, 0.0 }
 0x232   : > { %v922_v3 = vmax.f32 %v850_v63, 0.0 }
 0x233   : > { %v923_v5 = vmax.f32 %v852_v1, 0.0 }
 0x234   : > { %v956_v6 = vpack.c.bf16 %v922_v3, %v920_v2 }
 0x235   : > { %v957_v7 = vpack.c.bf16 %v923_v5, %v921_v4  ;;  %v855_v8 = vpop.f32.mrb[60].mxu0 }
 0x236   : > { %v856_v9 = vadd.f32 %v855_v8, %v2295_v37  ;;  %v857_v10 = vpop.f32.mrb[61].mxu0 }
 0x237   : > { %v858_v11 = vadd.f32 %v857_v10, %v2299_v38  ;;  %v859_v12 = vpop.f32.mrb[62].mxu0  ;;  %1336 = vmatprep.mubr.bf16.mxu1 %v957_v7 }
 0x238   : > { %v860_v13 = vadd.f32 %v859_v12, %v2295_v37  ;;  %v861_v14 = vpop.f32.mrb[63].mxu0  ;;  %1337 = vmatmul.mubr.bf16.gmra.mrb[56].mxu1 %v956_v6  ;;  %v924_v16 = vmax.f32 %v856_v9, 0.0  ;;  %v2371_v37 = vrot.slane %v992_v22, %v343_v34 }
 0x239   : > { %v862_v15 = vadd.f32 %v861_v14, %v2299_v38  ;;  %v925_v18 = vmax.f32 %v858_v11, 0.0  ;;  %v2375_v38 = vrot.slane %v992_v22, %v347_v36 }
 0x23a   : > { %v926_v17 = vmax.f32 %v860_v13, 0.0 }
 0x23b   : > { %v927_v19 = vmax.f32 %v862_v15, 0.0 }
 0x23c   : > { %v958_v20 = vpack.c.bf16 %v926_v17, %v924_v16 }
 0x23d   : > { %v959_v21 = vpack.c.bf16 %v927_v19, %v925_v18 }
 0x23f   : > { %1346 = vmatprep.mubr.bf16.mxu1 %v959_v21 }
 0x240   : > { %1347 = vmatmul.mubr.bf16.gmra.mrb[60].mxu1 %v958_v20 }
 0x29b   : > { %v1198_v23 = vpop.f32.mrb[0].mxu1 }
 0x29c   : > { %v1199_v24 = vadd.f32 %v1198_v23, %v2371_v37  ;;  %v1200_v25 = vpop.f32.mrb[1].mxu1 }
 0x29d   : > { %v1201_v26 = vadd.f32 %v1200_v25, %v2375_v38  ;;  %v1202_v27 = vpop.f32.mrb[2].mxu1 }
 0x29e   : > { %1357 = vst [vmem:[%s2379_s28] sm:$0xff] %v1199_v24  ;;  %v1203_v33 = vadd.f32 %v1202_v27, %v2371_v37  ;;  %v1204_v34 = vpop.f32.mrb[3].mxu1 }
 0x29f   : > { %1358 = vst [vmem:[%s2379_s28 + $0x8] sm:$0xff] %v1201_v26  ;;  %v1205_v36 = vadd.f32 %v1204_v34, %v2375_v38 }
 0x2a0   : > { %1359 = vst [vmem:[%s2379_s28 + $0x10] sm:$0xff] %v1203_v33 }
 0x2a1   : > { %1360 = vst [vmem:[%s2379_s28 + $0x18] sm:$0xff] %v1205_v36 }
 0x2a3   : > { %v1208_v28 = vpop.f32.mrb[4].mxu1 }
 0x2a4   : > { %v1209_v29 = vadd.f32 %v1208_v28, %v2371_v37  ;;  %v1210_v30 = vpop.f32.mrb[5].mxu1 }
 0x2a5   : > { %v1211_v31 = vadd.f32 %v1210_v30, %v2375_v38  ;;  %v1212_v32 = vpop.f32.mrb[6].mxu1 }
 0x2a6   : > { %1361 = vst [vmem:[%s2379_s28 + $0x20] sm:$0xff] %v1209_v29  ;;  %v1213_v35 = vadd.f32 %v1212_v32, %v2371_v37  ;;  %v1214_v39 = vpop.f32.mrb[7].mxu1 }
 0x2a7   : > { %1362 = vst [vmem:[%s2379_s28 + $0x28] sm:$0xff] %v1211_v31  ;;  %v1215_v40 = vadd.f32 %v1214_v39, %v2375_v38 }
 0x2a8   : > { %1363 = vst [vmem:[%s2379_s28 + $0x30] sm:$0xff] %v1213_v35 }
 0x2a9   : > { %1364 = vst [vmem:[%s2379_s28 + $0x38] sm:$0xff] %v1215_v40 }
 0x2ab   : > { %v1218_v41 = vpop.f32.mrb[8].mxu1 }
 0x2ac   : > { %v1219_v42 = vadd.f32 %v1218_v41, %v2371_v37  ;;  %v1220_v43 = vpop.f32.mrb[9].mxu1 }
 0x2ad   : > { %v1221_v44 = vadd.f32 %v1220_v43, %v2375_v38  ;;  %v1222_v45 = vpop.f32.mrb[10].mxu1 }
 0x2ae   : > { %1365 = vst [vmem:[%s2379_s28 + $0x40] sm:$0xff] %v1219_v42  ;;  %v1223_v46 = vadd.f32 %v1222_v45, %v2371_v37  ;;  %v1224_v47 = vpop.f32.mrb[11].mxu1 }
 0x2af   : > { %1366 = vst [vmem:[%s2379_s28 + $0x48] sm:$0xff] %v1221_v44  ;;  %v1225_v48 = vadd.f32 %v1224_v47, %v2375_v38 }
 0x2b0   : > { %1367 = vst [vmem:[%s2379_s28 + $0x50] sm:$0xff] %v1223_v46 }
 0x2b1   : > { %1368 = vst [vmem:[%s2379_s28 + $0x58] sm:$0xff] %v1225_v48 }
 0x2b3   : > { %v1228_v49 = vpop.f32.mrb[12].mxu1 }
 0x2b4   : > { %v1229_v50 = vadd.f32 %v1228_v49, %v2371_v37  ;;  %v1230_v51 = vpop.f32.mrb[13].mxu1 }
 0x2b5   : > { %v1231_v52 = vadd.f32 %v1230_v51, %v2375_v38  ;;  %v1232_v53 = vpop.f32.mrb[14].mxu1 }
 0x2b6   : > { %1369 = vst [vmem:[%s2379_s28 + $0x60] sm:$0xff] %v1229_v50  ;;  %v1233_v54 = vadd.f32 %v1232_v53, %v2371_v37  ;;  %v1234_v55 = vpop.f32.mrb[15].mxu1 }
 0x2b7   : > { %1370 = vst [vmem:[%s2379_s28 + $0x68] sm:$0xff] %v1231_v52  ;;  %v1235_v56 = vadd.f32 %v1234_v55, %v2375_v38 }
 0x2b8   : > { %1371 = vst [vmem:[%s2379_s28 + $0x70] sm:$0xff] %v1233_v54 }
 0x2b9   : > { %1372 = vst [vmem:[%s2379_s28 + $0x78] sm:$0xff] %v1235_v56 }
 0x2bb   : > { %v1238_v57 = vpop.f32.mrb[16].mxu1 }
 0x2bc   : > { %v1239_v58 = vadd.f32 %v1238_v57, %v2371_v37  ;;  %v1240_v59 = vpop.f32.mrb[17].mxu1 }
 0x2bd   : > { %v1241_v60 = vadd.f32 %v1240_v59, %v2375_v38  ;;  %v1242_v61 = vpop.f32.mrb[18].mxu1 }
 0x2be   : > { %1373 = vst [vmem:[%s2379_s28 + $0x80] sm:$0xff] %v1239_v58  ;;  %v1243_v62 = vadd.f32 %v1242_v61, %v2371_v37  ;;  %v1244_v63 = vpop.f32.mrb[19].mxu1 }
 0x2bf   : > { %1374 = vst [vmem:[%s2379_s28 + $0x88] sm:$0xff] %v1241_v60  ;;  %v1245_v0 = vadd.f32 %v1244_v63, %v2375_v38 }
 0x2c0   : > { %1375 = vst [vmem:[%s2379_s28 + $0x90] sm:$0xff] %v1243_v62 }
 0x2c1   : > { %1376 = vst [vmem:[%s2379_s28 + $0x98] sm:$0xff] %v1245_v0 }
 0x2c3   : > { %v1248_v1 = vpop.f32.mrb[20].mxu1 }
 0x2c4   : > { %v1249_v2 = vadd.f32 %v1248_v1, %v2371_v37  ;;  %v1250_v3 = vpop.f32.mrb[21].mxu1 }
 0x2c5   : > { %v1251_v4 = vadd.f32 %v1250_v3, %v2375_v38  ;;  %v1252_v5 = vpop.f32.mrb[22].mxu1 }
 0x2c6   : > { %1377 = vst [vmem:[%s2379_s28 + $0xa0] sm:$0xff] %v1249_v2  ;;  %v1253_v6 = vadd.f32 %v1252_v5, %v2371_v37  ;;  %v1254_v7 = vpop.f32.mrb[23].mxu1 }
 0x2c7   : > { %1378 = vst [vmem:[%s2379_s28 + $0xa8] sm:$0xff] %v1251_v4  ;;  %v1255_v8 = vadd.f32 %v1254_v7, %v2375_v38 }
 0x2c8   : > { %1379 = vst [vmem:[%s2379_s28 + $0xb0] sm:$0xff] %v1253_v6 }
 0x2c9   : > { %1380 = vst [vmem:[%s2379_s28 + $0xb8] sm:$0xff] %v1255_v8 }
 0x2cb   : > { %v1258_v9 = vpop.f32.mrb[24].mxu1 }
 0x2cc   : > { %v1259_v10 = vadd.f32 %v1258_v9, %v2371_v37  ;;  %v1260_v11 = vpop.f32.mrb[25].mxu1 }
 0x2cd   : > { %v1261_v12 = vadd.f32 %v1260_v11, %v2375_v38  ;;  %v1262_v13 = vpop.f32.mrb[26].mxu1 }
 0x2ce   : > { %1381 = vst [vmem:[%s2379_s28 + $0xc0] sm:$0xff] %v1259_v10  ;;  %v1263_v14 = vadd.f32 %v1262_v13, %v2371_v37  ;;  %v1264_v15 = vpop.f32.mrb[27].mxu1 }
 0x2cf   : > { %1382 = vst [vmem:[%s2379_s28 + $0xc8] sm:$0xff] %v1261_v12  ;;  %v1265_v16 = vadd.f32 %v1264_v15, %v2375_v38 }
 0x2d0   : > { %1383 = vst [vmem:[%s2379_s28 + $0xd0] sm:$0xff] %v1263_v14 }
 0x2d1   : > { %1384 = vst [vmem:[%s2379_s28 + $0xd8] sm:$0xff] %v1265_v16 }
 0x2d3   : > { %v1268_v17 = vpop.f32.mrb[28].mxu1 }
 0x2d4   : > { %v1269_v18 = vadd.f32 %v1268_v17, %v2371_v37  ;;  %v1270_v19 = vpop.f32.mrb[29].mxu1 }
 0x2d5   : > { %v1271_v20 = vadd.f32 %v1270_v19, %v2375_v38  ;;  %v1272_v21 = vpop.f32.mrb[30].mxu1 }
 0x2d6   : > { %1385 = vst [vmem:[%s2379_s28 + $0xe0] sm:$0xff] %v1269_v18  ;;  %v1273_v22 = vadd.f32 %v1272_v21, %v2371_v37  ;;  %v1274_v23 = vpop.f32.mrb[31].mxu1 }
 0x2d7   : > { %1386 = vst [vmem:[%s2379_s28 + $0xe8] sm:$0xff] %v1271_v20  ;;  %v1275_v24 = vadd.f32 %v1274_v23, %v2375_v38 }
 0x2d8   : > { %1387 = vst [vmem:[%s2379_s28 + $0xf0] sm:$0xff] %v1273_v22 }
 0x2d9   : > { %1388 = vst [vmem:[%s2379_s28 + $0xf8] sm:$0xff] %v1275_v24 }
 0x2db   : > { %v1278_v25 = vpop.f32.mrb[32].mxu1 }
 0x2dc   : > { %v1279_v26 = vadd.f32 %v1278_v25, %v2371_v37  ;;  %v1280_v27 = vpop.f32.mrb[33].mxu1 }
 0x2dd   : > { %v1281_v33 = vadd.f32 %v1280_v27, %v2375_v38  ;;  %v1282_v34 = vpop.f32.mrb[34].mxu1 }
 0x2de   : > { %1389 = vst [vmem:[%s2379_s28 + $0x100] sm:$0xff] %v1279_v26  ;;  %v1283_v36 = vadd.f32 %v1282_v34, %v2371_v37  ;;  %v1284_v28 = vpop.f32.mrb[35].mxu1 }
 0x2df   : > { %1390 = vst [vmem:[%s2379_s28 + $0x108] sm:$0xff] %v1281_v33  ;;  %v1285_v29 = vadd.f32 %v1284_v28, %v2375_v38 }
 0x2e0   : > { %1391 = vst [vmem:[%s2379_s28 + $0x110] sm:$0xff] %v1283_v36 }
 0x2e1   : > { %1392 = vst [vmem:[%s2379_s28 + $0x118] sm:$0xff] %v1285_v29 }
 0x2e3   : > { %v1288_v30 = vpop.f32.mrb[36].mxu1 }
 0x2e4   : > { %v1289_v31 = vadd.f32 %v1288_v30, %v2371_v37  ;;  %v1290_v32 = vpop.f32.mrb[37].mxu1 }
 0x2e5   : > { %v1291_v35 = vadd.f32 %v1290_v32, %v2375_v38  ;;  %v1292_v39 = vpop.f32.mrb[38].mxu1 }
 0x2e6   : > { %1393 = vst [vmem:[%s2379_s28 + $0x120] sm:$0xff] %v1289_v31  ;;  %v1293_v40 = vadd.f32 %v1292_v39, %v2371_v37  ;;  %v1294_v41 = vpop.f32.mrb[39].mxu1 }
 0x2e7   : > { %1394 = vst [vmem:[%s2379_s28 + $0x128] sm:$0xff] %v1291_v35  ;;  %v1295_v42 = vadd.f32 %v1294_v41, %v2375_v38 }
 0x2e8   : > { %1395 = vst [vmem:[%s2379_s28 + $0x130] sm:$0xff] %v1293_v40 }
 0x2e9   : > { %1396 = vst [vmem:[%s2379_s28 + $0x138] sm:$0xff] %v1295_v42 }
 0x2eb   : > { %v1298_v43 = vpop.f32.mrb[40].mxu1 }
 0x2ec   : > { %v1299_v44 = vadd.f32 %v1298_v43, %v2371_v37  ;;  %v1300_v45 = vpop.f32.mrb[41].mxu1 }
 0x2ed   : > { %v1301_v46 = vadd.f32 %v1300_v45, %v2375_v38  ;;  %v1302_v47 = vpop.f32.mrb[42].mxu1 }
 0x2ee   : > { %1397 = vst [vmem:[%s2379_s28 + $0x140] sm:$0xff] %v1299_v44  ;;  %v1303_v48 = vadd.f32 %v1302_v47, %v2371_v37  ;;  %v1304_v49 = vpop.f32.mrb[43].mxu1 }
 0x2ef   : > { %1398 = vst [vmem:[%s2379_s28 + $0x148] sm:$0xff] %v1301_v46  ;;  %v1305_v50 = vadd.f32 %v1304_v49, %v2375_v38 }
 0x2f0   : > { %1399 = vst [vmem:[%s2379_s28 + $0x150] sm:$0xff] %v1303_v48 }
 0x2f1   : > { %1400 = vst [vmem:[%s2379_s28 + $0x158] sm:$0xff] %v1305_v50 }
 0x2f3   : > { %v1308_v51 = vpop.f32.mrb[44].mxu1 }
 0x2f4   : > { %v1309_v52 = vadd.f32 %v1308_v51, %v2371_v37  ;;  %v1310_v53 = vpop.f32.mrb[45].mxu1 }
 0x2f5   : > { %v1311_v54 = vadd.f32 %v1310_v53, %v2375_v38  ;;  %v1312_v55 = vpop.f32.mrb[46].mxu1 }
 0x2f6   : > { %1401 = vst [vmem:[%s2379_s28 + $0x160] sm:$0xff] %v1309_v52  ;;  %v1313_v56 = vadd.f32 %v1312_v55, %v2371_v37  ;;  %v1314_v57 = vpop.f32.mrb[47].mxu1 }
 0x2f7   : > { %1402 = vst [vmem:[%s2379_s28 + $0x168] sm:$0xff] %v1311_v54  ;;  %v1315_v58 = vadd.f32 %v1314_v57, %v2375_v38 }
 0x2f8   : > { %1403 = vst [vmem:[%s2379_s28 + $0x170] sm:$0xff] %v1313_v56 }
 0x2f9   : > { %1404 = vst [vmem:[%s2379_s28 + $0x178] sm:$0xff] %v1315_v58 }
 0x2fb   : > { %v1318_v59 = vpop.f32.mrb[48].mxu1 }
 0x2fc   : > { %v1319_v60 = vadd.f32 %v1318_v59, %v2371_v37  ;;  %v1320_v61 = vpop.f32.mrb[49].mxu1 }
 0x2fd   : > { %v1321_v62 = vadd.f32 %v1320_v61, %v2375_v38  ;;  %v1322_v63 = vpop.f32.mrb[50].mxu1 }
 0x2fe   : > { %1405 = vst [vmem:[%s2379_s28 + $0x180] sm:$0xff] %v1319_v60  ;;  %v1323_v0 = vadd.f32 %v1322_v63, %v2371_v37  ;;  %v1324_v1 = vpop.f32.mrb[51].mxu1 }
 0x2ff   : > { %1406 = vst [vmem:[%s2379_s28 + $0x188] sm:$0xff] %v1321_v62  ;;  %v1325_v2 = vadd.f32 %v1324_v1, %v2375_v38 }
 0x300   : > { %1407 = vst [vmem:[%s2379_s28 + $0x190] sm:$0xff] %v1323_v0 }
 0x301   : > { %1408 = vst [vmem:[%s2379_s28 + $0x198] sm:$0xff] %v1325_v2 }
 0x303   : > { %v1328_v3 = vpop.f32.mrb[52].mxu1 }
 0x304   : > { %v1329_v4 = vadd.f32 %v1328_v3, %v2371_v37  ;;  %v1330_v5 = vpop.f32.mrb[53].mxu1 }
 0x305   : > { %v1331_v6 = vadd.f32 %v1330_v5, %v2375_v38  ;;  %v1332_v7 = vpop.f32.mrb[54].mxu1 }
 0x306   : > { %1409 = vst [vmem:[%s2379_s28 + $0x1a0] sm:$0xff] %v1329_v4  ;;  %v1333_v8 = vadd.f32 %v1332_v7, %v2371_v37  ;;  %v1334_v9 = vpop.f32.mrb[55].mxu1 }
 0x307   : > { %1410 = vst [vmem:[%s2379_s28 + $0x1a8] sm:$0xff] %v1331_v6  ;;  %v1335_v10 = vadd.f32 %v1334_v9, %v2375_v38 }
 0x308   : > { %1411 = vst [vmem:[%s2379_s28 + $0x1b0] sm:$0xff] %v1333_v8 }
 0x309   : > { %1412 = vst [vmem:[%s2379_s28 + $0x1b8] sm:$0xff] %v1335_v10 }
 0x30b   : > { %v1338_v11 = vpop.f32.mrb[56].mxu1 }
 0x30c   : > { %v1339_v12 = vadd.f32 %v1338_v11, %v2371_v37  ;;  %v1340_v13 = vpop.f32.mrb[57].mxu1 }
 0x30d   : > { %v1341_v14 = vadd.f32 %v1340_v13, %v2375_v38  ;;  %v1342_v15 = vpop.f32.mrb[58].mxu1 }
 0x30e   : > { %1413 = vst [vmem:[%s2379_s28 + $0x1c0] sm:$0xff] %v1339_v12  ;;  %v1343_v16 = vadd.f32 %v1342_v15, %v2371_v37  ;;  %v1344_v17 = vpop.f32.mrb[59].mxu1 }
 0x30f   : > { %1414 = vst [vmem:[%s2379_s28 + $0x1c8] sm:$0xff] %v1341_v14  ;;  %v1345_v18 = vadd.f32 %v1344_v17, %v2375_v38 }
 0x310   : > { %1415 = vst [vmem:[%s2379_s28 + $0x1d0] sm:$0xff] %v1343_v16 }
 0x311   : > { %1416 = vst [vmem:[%s2379_s28 + $0x1d8] sm:$0xff] %v1345_v18 }
 0x313   : > { %v1348_v19 = vpop.f32.mrb[60].mxu1 }
 0x314   : > { %v1349_v20 = vadd.f32 %v1348_v19, %v2371_v37  ;;  %v1350_v21 = vpop.f32.mrb[61].mxu1 }
 0x315   : > { %v1351_v22 = vadd.f32 %v1350_v21, %v2375_v38  ;;  %v1352_v23 = vpop.f32.mrb[62].mxu1 }
 0x316   : > { %1417 = vst [vmem:[%s2379_s28 + $0x1e0] sm:$0xff] %v1349_v20  ;;  %v1353_v24 = vadd.f32 %v1352_v23, %v2371_v37  ;;  %v1354_v25 = vpop.f32.mrb[63].mxu1 }
 0x317   : > { %1418 = vst [vmem:[%s2379_s28 + $0x1e8] sm:$0xff] %v1351_v22  ;;  %v1355_v26 = vadd.f32 %v1354_v25, %v2375_v38 }
 0x318   : > { %1419 = vst [vmem:[%s2379_s28 + $0x1f0] sm:$0xff] %v1353_v24 }
 0x319   : > { %1420 = vst [vmem:[%s2379_s28 + $0x1f8] sm:$0xff] %v1355_v26 }
 0x31a   : > { %1962 = shalt.err (!%p1959_p1)
}
 0x31b   : > { %s1963_s24 = scalar_lea.hbm %s2508_s17, 8192  ;;  %s1967_s16 = scalar_lea.hbm %s2563_s5, 16384 }
 0x31c   : > { %p1964_p13 = scmp.ne.s32.totalorder %s2508_s17, %s1963_s24  ;;  %p1968_p4 = scmp.lt.u32.totalorder %s2508_s17, %s2563_s5 }
 0x31d   : > { %p1969_p5 = scmp.lt.u32.totalorder %s1967_s16, %s1963_s24  ;;  %p1971_p11 = scmp.lt.u32.totalorder %s1963_s24, %s2508_s17 }
 0x31e   : > { %p1965_p6 = pnand %p1964_p13, %p2577_p0 }
 0x31f   : > { %p1970_p8 = por %p1969_p5, %p1968_p4 }
 0x320   : > { %p1966_p10 = pneg %p1965_p6 }
 0x321   : > { %p1972_p2 = por %p1971_p11, %p1970_p8 }
 0x323   : > { %p1973_p3 = pnand %p1972_p2, %p1966_p10 }
 0x325   : > { %1976 = shalt.err (!%p1973_p3)
}
 0x326   : > { %s2027_s12 = smov 256   ;;  %s2028_s30 = smov 16  }
 0x327   : > { %1658 = dma.vmem_to_hbm [thread:$0]  (%p2577_p0), %s2510_s13, 8192, %s2508_s17, %s1422_s22, %s2027_s12, %s2027_s12, %s2028_s30  }
 0x328 PF: > { %s1451_s11 = sand.u32 1, %s2007_s18   ;;  %p2578_p7 = scmp.ne.s32.totalorder %s2568_s25, 0 }
 0x329   : > { %p2579_p9 = scmp.ge.s32.totalorder %s2019_s21, 2  ;;  %s1452_s7 = scalar_lea.sflag [#allocation4], %s1451_s11 }
 0x32b   : > { %p1672_p12 = pnand %p2579_p9, %p2578_p7 }
 0x32d   : > { %2002 = dma.done.wait (!%p1672_p12), %s1452_s7, 8192  }
 0x32e   : > { %2004 = vsyncadd (!%p1672_p12), %s1452_s7, 4294959104  ;;  %p19_p1 = scmp.ge.s32.totalorder %s2175_s29, 4   ;;  %s2580_s18 = smov %s2011_s19 }
 0x32f   : > { %s2581_s19 = smov %s2015_s20  ;;  %s2582_s20 = smov %s2191_s27 }
 0x330   : > { %s2583_s21 = smov %s2175_s29  ;;  %21 = sbr.rel (!%p19_p1) target bundleno = 6 (0x6), region = 93 }
 0x337   :  { %1457 = vsyncpa [#allocation3], 1 }
 0x338   :  { %1459 = vsyncpa [#allocation3 + $0x1], 1 }
 0x339   :  { %1460 = vsyncpa [#allocation6], 1 }
 0x33a   :  { %1461 = vsyncpa [#allocation4], 1 }
 0x33b   :  { %1463 = vsyncpa [#allocation4 + $0x1], 1 }

// kernel: tpu_custom_call.1
= control target key start
LH: loop header
LB: loop body
LE: loop exit
PB: predicated region body
PF: predicated region fallthrough
CT: control target
= control target key end

     0   :  { %10 = vsyncpa [#allocation3], 0  ;;  %s2558_s0 = inlined_call_operand.hbm [shape: bf16[512,256], index: 0, kind: input, shape index: {}]   ;;  %s2559_s1 = inlined_call_operand.hbm [shape: bf16[256,256], index: 1, kind: input, shape index: {}]   ;;  %s2560_s2 = inlined_call_operand.vmem [shape: f32[1,256], index: 2, kind: input, shape index: {}]   ;;  %s2561_s3 = inlined_call_operand.hbm [shape: bf16[256,256], index: 3, kind: input, shape index: {}]   ;;  %s2562_s4 = inlined_call_operand.vmem [shape: f32[1,256], index: 4, kind: input, shape index: {}]   ;;  %s2563_s5 = inlined_call_operand.hbm [shape: f32[512,256], index: 5, kind: output, shape index: {}]  }
   0x1   :  { %12 = vsyncpa [#allocation3 + $0x1], 0 }
   0x2   :  { %13 = vsyncpa [#allocation6], 0 }
   0x3   :  { %14 = vsyncpa [#allocation4], 0 }
   0x4   :  { %16 = vsyncpa [#allocation4 + $0x1], 0  ;;  %s2059_s18 = smov 0   ;;  %s2061_s19 = smov 0  }
   0x5   :  { %s2063_s20 = smov 0   ;;  %s2065_s21 = smov 0  }
   0x6 LB: > { %s2080_s22 = sadd.s32 4294967295, %s2019_s21   ;;  %s1528_s23 = sadd.s32 4294967294, %s2019_s21   ;;  %s2019_s21 = sphi %s2065_s21, %s2583_s21   ;;  %s2015_s20 = sphi %s2063_s20, %s2582_s20   ;;  %s2011_s19 = sphi %s2061_s19, %s2581_s19   ;;  %s2007_s18 = sphi %s2059_s18, %s2580_s18  }
   0x7   : > { %p42_p0 = scmp.ne.s32.totalorder %s2011_s19, %s2007_s18  ;;  %p2564_p1 = scmp.eq.s32.totalorder %s2080_s22, 0 }
   0x8   : > { %p156_p3 = scmp.eq.s32.totalorder %s1528_s23, 1  ;;  %p1529_p5 = scmp.ge.s32.totalorder %s2019_s21, 1 }
   0x9   : > { %p2089_p4 = por %p2564_p1, %p42_p0  ;;  %p163_p7 = scmp.lt.s32.totalorder %s2019_s21, 3 }
   0xa   : > { %p2094_p6 = por %p156_p3, %p42_p0  ;;  %s2021_s27 = smov [#allocation5]  }
   0xb   : > { %s2567_s24 = scalar_select %p2089_p4, 1, 0 }
   0xc   : > { %s2568_s25 = scalar_select %p2094_p6, 1, 0 }
   0xd   : > { %p2099_p8 = pnand %p1529_p5, %p163_p7  ;;  %s175_s28 = sshll.u32 %s2021_s27, 4  ;;  %s2103_s28 = int_to_ptr.vmem [resolvable:$true] %s175_s28 }
   0xe   : > { %s2022_s30 = smov [#allocation7]   ;;  %s1863_s9 = scalar_lea.hbm %s2559_s1, 4096 }
   0xf   : > { %p1660_p9 = pneg %p2099_p8  ;;  %s191_s6 = sshll.u32 %s2022_s30, 4  ;;  %s2114_s6 = int_to_ptr.vmem [resolvable:$true] %s191_s6 }
  0x10   : > { %p1864_p12 = scmp.ne.s32.totalorder %s2559_s1, %s1863_s9  ;;  %p1870_p5 = scmp.lt.u32.totalorder %s1863_s9, %s2559_s1 }
  0x11   : > { %p2110_p11 = pnand %p1660_p9, %p2564_p1 }
  0x13   : > { %p1865_p13 = pneg %p2110_p11 }
  0x15   : > { %p1866_p0 = pnand %p1865_p13, %p1864_p12 }
  0x17   : > { %p1867_p3 = pneg %p1866_p0 }
  0x19   : > { %p1872_p7 = pnand %p1870_p5, %p1867_p3 }
  0x1b   : > { %1875 = shalt.err (!%p1872_p7)
}
  0x1c   : > { %s1876_s14 = scalar_lea.vmem %s2103_s28, 4096  ;;  %p1884_p2 = scmp.lt.s32.totalorder %s2103_s28, %s2103_s28 }
  0x1d   : > { %p1877_p9 = scmp.ne.s32.totalorder %s2103_s28, %s1876_s14  ;;  %p1885_p12 = scmp.lt.s32.totalorder %s1876_s14, %s1876_s14 }
  0x1f   : > { %p1879_p10 = pnand %p1877_p9, %p1865_p13  ;;  %p1886_p0 = por %p1885_p12, %p1884_p2 }
  0x21   : > { %p1880_p1 = pneg %p1879_p10 }
  0x23   : > { %p1887_p6 = pnand %p1886_p0, %p1880_p1 }
  0x25   : > { %1890 = shalt.err (!%p1887_p6)
}
  0x26   : > { %s2023_s15 = smov 128   ;;  %s2024_s16 = smov 8  }
  0x27   : > { %1663 = dma.hbm_to_vmem [thread:$0]  (!%p2110_p11), %s2559_s1, 4096, %s2103_s28, [#allocation6], %s2023_s15, %s2023_s15, %s2024_s16  }
  0x28   : > { %s1891_s7 = scalar_lea.hbm %s2561_s3, 4096 }
  0x29   : > { %p1892_p1 = scmp.ne.s32.totalorder %s2561_s3, %s1891_s7  ;;  %p1898_p10 = scmp.lt.u32.totalorder %s1891_s7, %s2561_s3 }
  0x2b   : > { %p1894_p2 = pnand %p1892_p1, %p1865_p13 }
  0x2d   : > { %p1895_p6 = pneg %p1894_p2 }
  0x2f   : > { %p1900_p3 = pnand %p1898_p10, %p1895_p6 }
  0x31   : > { %1903 = shalt.err (!%p1900_p3)
}
  0x32   : > { %s1904_s28 = scalar_lea.vmem %s2114_s6, 4096  ;;  %p1912_p12 = scmp.lt.s32.totalorder %s2114_s6, %s2114_s6 }
  0x33   : > { %p1905_p5 = scmp.ne.s32.totalorder %s2114_s6, %s1904_s28  ;;  %p1913_p0 = scmp.lt.s32.totalorder %s1904_s28, %s1904_s28 }
  0x35   : > { %p1907_p7 = pnand %p1905_p5, %p1865_p13  ;;  %p1914_p1 = por %p1913_p0, %p1912_p12 }
  0x37   : > { %p1908_p9 = pneg %p1907_p7 }
  0x39   : > { %p1915_p2 = pnand %p1914_p1, %p1908_p9 }
  0x3b   : > { %1918 = shalt.err (!%p1915_p2)
}
  0x3c   : > { %1666 = dma.hbm_to_vmem [thread:$0]  (!%p2110_p11), %s2561_s3, 4096, %s2114_s6, [#allocation6], %s2023_s15, %s2023_s15, %s2024_s16  }
  0x3d   : > { %s2175_s29 = sadd.s32 1, %s2019_s21   ;;  %s29_s14 = sadd.s32 1, %s2015_s20 }
  0x3e   : > { %s26_s17 = ssub.s32 %s2019_s21, %s2175_s29  ;;  %p36_p13 = scmp.ne.s32.totalorder %s2015_s20, %s2011_s19 }
  0x3f   : > { %p27_p6 = scmp.eq.s32.totalorder %s26_s17, 0  ;;  %p37_p10 = scmp.eq.s32.totalorder %s2019_s21, 0 }
  0x40   : > { %p2571_p3 = scmp.eq.s32.totalorder %s2080_s22, 1  ;;  %p1677_p7 = scmp.lt.s32.totalorder %s2019_s21, 2 }
  0x41   : > { %s2191_s27 = scalar_select %p27_p6, %s2015_s20, %s29_s14  }
  0x42   : > { %p2185_p5 = por %p2571_p3, %p36_p13  ;;  %p38_p9 = por %p37_p10, %p36_p13 }
  0x43   : > { %s208_s30 = sand.u32 1, %s2015_s20   ;;  %s1645_s6 = sshll.u32 %s2019_s21, 12 }
  0x44   : > { %s2572_s23 = scalar_select %p2185_p5, 1, 0 }
  0x45   : > { %s1533_s7 = sshll.u32 %s208_s30, 8  ;;  %s2198_s10 = scalar_lea.hbm %s2558_s0, %s1645_s6 }
  0x46   : > { %s212_s11 = scalar_lea.vmem [#allocation2], %s1533_s7  ;;  %p2202_p11 = pnand %p1677_p7, %p38_p9 }
  0x47   : > { %s220_s28 = sshll.u32 %s212_s11, 4  ;;  %s2206_s13 = scalar_lea.sflag [#allocation3], %s208_s30  ;;  %s2200_s28 = int_to_ptr.vmem [resolvable:$true] %s220_s28 }
  0x48   : > { %s1919_s14 = scalar_lea.hbm %s2198_s10, 4096  ;;  %p1921_p0 = pneg %p2202_p11 }
  0x49   : > { %p1920_p12 = scmp.ne.s32.totalorder %s2198_s10, %s1919_s14  ;;  %s1924_s6 = scalar_lea.hbm %s2558_s0, 8192 }
  0x4a   : > { %p1925_p13 = scmp.lt.u32.totalorder %s2198_s10, %s2558_s0  ;;  %p1926_p6 = scmp.lt.u32.totalorder %s1924_s6, %s1919_s14 }
  0x4b   : > { %p1922_p1 = pnand %p1921_p0, %p1920_p12  ;;  %p1928_p3 = scmp.lt.u32.totalorder %s1919_s14, %s2198_s10 }
  0x4c   : > { %p1927_p10 = por %p1926_p6, %p1925_p13 }
  0x4d   : > { %p1923_p2 = pneg %p1922_p1 }
  0x4e   : > { %p1929_p7 = por %p1928_p3, %p1927_p10 }
  0x50   : > { %p1930_p9 = pnand %p1929_p7, %p1923_p2 }
  0x52   : > { %1933 = shalt.err (!%p1930_p9)
}
  0x53   : > { %s1934_s30 = scalar_lea.vmem %s2200_s28, 4096  ;;  %s2025_s11 = smov [#allocation2]  }
  0x54   : > { %p1935_p12 = scmp.ne.s32.totalorder %s2200_s28, %s1934_s30  ;;  %s1939_s17 = sshll.u32 %s2025_s11, 4  ;;  %s1940_s17 = int_to_ptr.vmem [resolvable:$false] %s1939_s17 }
  0x55   : > { %s1941_s7 = scalar_lea.vmem %s1940_s17, 8192  ;;  %p1942_p4 = scmp.lt.s32.totalorder %s2200_s28, %s1940_s17 }
  0x56   : > { %p1937_p1 = pnand %p1935_p12, %p1921_p0  ;;  %p1943_p13 = scmp.lt.s32.totalorder %s1941_s7, %s1934_s30 }
  0x58   : > { %p1938_p5 = pneg %p1937_p1  ;;  %p1944_p6 = por %p1943_p13, %p1942_p4 }
  0x5a   : > { %p1945_p10 = pnand %p1944_p6, %p1938_p5 }
  0x5c   : > { %1948 = shalt.err (!%p1945_p10)
}
  0x5d   : > { %1670 = dma.hbm_to_vmem [thread:$0]  (!%p2202_p11), %s2198_s10, 4096, %s2200_s28, %s2206_s13, %s2023_s15, %s2023_s15, %s2024_s16  }
  0x5e   : > { %232 = sbr.rel (%p2099_p8) target bundleno = 808 (0x328), region = 40  ;;  %s2240_s14 = sand.u32 (!%p2099_p8), 1, %s2011_s19  }
  0x5f   : > { %s1538_s6 = sshll.u32 (!%p2099_p8), %s2240_s14, 8  ;;  %s235_s8 = scalar_lea.sflag (!%p2099_p8), [#allocation3], %s2240_s14 }
  0x60   : > { %s2244_s9 = scalar_lea.vmem (!%p2099_p8), [#allocation2], %s1538_s6  ;;  %p2574_p4 = scmp.ne.s32.totalorder (!%p2099_p8), %s2567_s24, 0 }
  0x65   : > { %1994 = dma.done.wait (%p2574_p4), %s235_s8, 4096  }
  0x66   : > { %1996 = vsyncadd (%p2574_p4), %s235_s8, 4294963200  ;;  %p2575_p5 = scmp.eq.s32.totalorder %s2080_s22, 0 }
  0x68   : > { %1998 = dma.done.wait (%p2575_p5), [#allocation6], 8192   ;;  %p2576_p8 = pmov %p2575_p5 }
  0x69   : > { %v1719_v0 = vld [vmem:[#allocation5 + $0x4] ss:$8 sps:$4 sm:$0xff]   ;;  %v1721_v1 = vld [vmem:[#allocation5] ss:$8 sps:$4 sm:$0xff]   ;;  %v1722_v2 = vld [vmem:[#allocation5 + $0x14] ss:$8 sps:$4 sm:$0xff]  }
  0x6a   : > { %2000 = vsyncadd (%p2576_p8), [#allocation6], 4294959104  ;;  %671 = vmatprep.subr.bf16.mxu0 %v1719_v0  ;;  %v1724_v3 = vld [vmem:[#allocation5 + $0x10] ss:$8 sps:$4 sm:$0xff]   ;;  %v1725_v4 = vld [vmem:[#allocation5 + $0x24] ss:$8 sps:$4 sm:$0xff]  }
  0x6b   : > { %672 = vmatpush1.bf16.xpose.msra.mxu0 %v1721_v1  ;;  %v1727_v5 = vld [vmem:[#allocation5 + $0x20] ss:$8 sps:$4 sm:$0xff]   ;;  %v1728_v6 = vld [vmem:[#allocation5 + $0x34] ss:$8 sps:$4 sm:$0xff]   ;;  %v1769_v7 = vld [vmem:[%s2244_s9 + $0x4] ss:$8 sps:$4 sm:$0xff]  }
  0x6c   : > { %673 = vmatprep.subr.bf16.mxu0 %v1722_v2  ;;  %v1730_v8 = vld [vmem:[#allocation5 + $0x30] ss:$8 sps:$4 sm:$0xff]   ;;  %v1731_v9 = vld [vmem:[#allocation5 + $0x44] ss:$8 sps:$4 sm:$0xff]   ;;  %703 = vmatprep.mubr.bf16.mxu0 %v1769_v7  ;;  %v1733_v10 = vld [vmem:[#allocation5 + $0x40] ss:$8 sps:$4 sm:$0xff]  }
  0x6d   : > { %v1734_v11 = vld [vmem:[#allocation5 + $0x54] ss:$8 sps:$4 sm:$0xff]   ;;  %v1736_v12 = vld [vmem:[#allocation5 + $0x50] ss:$8 sps:$4 sm:$0xff]   ;;  %v1737_v13 = vld [vmem:[#allocation5 + $0x64] ss:$8 sps:$4 sm:$0xff]  }
  0x6e   : > { %v1739_v14 = vld [vmem:[#allocation5 + $0x60] ss:$8 sps:$4 sm:$0xff]   ;;  %v1740_v15 = vld [vmem:[#allocation5 + $0x74] ss:$8 sps:$4 sm:$0xff]   ;;  %v1742_v16 = vld [vmem:[#allocation5 + $0x70] ss:$8 sps:$4 sm:$0xff]  }
  0x6f   : > { %v1743_v17 = vld [vmem:[#allocation5 + $0x84] ss:$8 sps:$4 sm:$0xff]   ;;  %v1745_v18 = vld [vmem:[#allocation5 + $0x80] ss:$8 sps:$4 sm:$0xff]   ;;  %v1746_v19 = vld [vmem:[#allocation5 + $0x94] ss:$8 sps:$4 sm:$0xff]  }
  0x70   : > { %v1748_v20 = vld [vmem:[#allocation5 + $0x90] ss:$8 sps:$4 sm:$0xff]   ;;  %v1749_v21 = vld [vmem:[#allocation5 + $0xa4] ss:$8 sps:$4 sm:$0xff]   ;;  %v1751_v22 = vld [vmem:[#allocation5 + $0xa0] ss:$8 sps:$4 sm:$0xff]  }
  0x71   : > { %v1752_v23 = vld [vmem:[#allocation5 + $0xb4] ss:$8 sps:$4 sm:$0xff]   ;;  %v1754_v24 = vld [vmem:[#allocation5 + $0xb0] ss:$8 sps:$4 sm:$0xff]   ;;  %v1755_v25 = vld [vmem:[#allocation5 + $0xc4] ss:$8 sps:$4 sm:$0xff]  }
  0x72   : > { %v1803_v26 = vld [vmem:[#allocation7 + $0x4] ss:$8 sps:$4 sm:$0xff]   ;;  %v1807_v27 = vld [vmem:[#allocation7] ss:$8 sps:$4 sm:$0xff]   ;;  %v1758_v29 = vld [vmem:[#allocation5 + $0xd4] ss:$8 sps:$4 sm:$0xff]  }
  0x73   : > { %674 = vmatpush1.bf16.xpose.msra.mxu0 %v1724_v3  ;;  %1164 = vmatprep.subr.bf16.mxu1 %v1803_v26  ;;  %v1757_v28 = vld [vmem:[#allocation5 + $0xc0] ss:$8 sps:$4 sm:$0xff]   ;;  %v1809_v30 = vld [vmem:[#allocation7 + $0x14] ss:$8 sps:$4 sm:$0xff]   ;;  %v1813_v31 = vld [vmem:[#allocation7 + $0x10] ss:$8 sps:$4 sm:$0xff]  }
  0x74   : > { %675 = vmatprep.subr.bf16.mxu0 %v1725_v4  ;;  %1165 = vmatpush1.bf16.xpose.msra.mxu1 %v1807_v27  ;;  %v1760_v32 = vld [vmem:[#allocation5 + $0xd0] ss:$8 sps:$4 sm:$0xff]   ;;  %v1761_v33 = vld [vmem:[#allocation5 + $0xe4] ss:$8 sps:$4 sm:$0xff]   ;;  %v1819_v35 = vld [vmem:[#allocation7 + $0x20] ss:$8 sps:$4 sm:$0xff]  }
  0x75   : > { %1166 = vmatprep.subr.bf16.mxu1 %v1809_v30  ;;  %v1815_v34 = vld [vmem:[#allocation7 + $0x24] ss:$8 sps:$4 sm:$0xff]   ;;  %v1763_v36 = vld [vmem:[#allocation5 + $0xe0] ss:$8 sps:$4 sm:$0xff]   ;;  %v1764_v37 = vld [vmem:[#allocation5 + $0xf4] ss:$8 sps:$4 sm:$0xff]  }
  0x76   : > { %v1821_v38 = vld [vmem:[#allocation7 + $0x34] ss:$8 sps:$4 sm:$0xff]   ;;  %v1825_v39 = vld [vmem:[#allocation7 + $0x30] ss:$8 sps:$4 sm:$0xff]   ;;  %v1827_v41 = vld [vmem:[#allocation7 + $0x44] ss:$8 sps:$4 sm:$0xff]  }
  0x77   : > { %v1766_v40 = vld [vmem:[#allocation5 + $0xf0] ss:$8 sps:$4 sm:$0xff]   ;;  %v1829_v42 = vld [vmem:[#allocation7 + $0x40] ss:$8 sps:$4 sm:$0xff]   ;;  %v1830_v43 = vld [vmem:[#allocation7 + $0x54] ss:$8 sps:$4 sm:$0xff]  }
  0x78   : > { %v1767_v44 = vld [vmem:[%s2244_s9] ss:$8 sps:$4 sm:$0xff]   ;;  %v1770_v45 = vld [vmem:[%s2244_s9 + $0x14] ss:$8 sps:$4 sm:$0xff]   ;;  %v1832_v46 = vld [vmem:[#allocation7 + $0x50] ss:$8 sps:$4 sm:$0xff]  }
  0x79   : > { %v1833_v47 = vld [vmem:[#allocation7 + $0x64] ss:$8 sps:$4 sm:$0xff]   ;;  %v1772_v48 = vld [vmem:[%s2244_s9 + $0x10] ss:$8 sps:$4 sm:$0xff]   ;;  %v1835_v50 = vld [vmem:[#allocation7 + $0x60] ss:$8 sps:$4 sm:$0xff]  }
  0x7a   : > { %v1773_v49 = vld [vmem:[%s2244_s9 + $0x24] ss:$8 sps:$4 sm:$0xff]   ;;  %v1836_v51 = vld [vmem:[#allocation7 + $0x74] ss:$8 sps:$4 sm:$0xff]   ;;  %v1775_v52 = vld [vmem:[%s2244_s9 + $0x20] ss:$8 sps:$4 sm:$0xff]  }
  0x7b   : > { %676 = vmatpush1.bf16.xpose.msra.mxu0 %v1727_v5  ;;  %v1776_v53 = vld [vmem:[%s2244_s9 + $0x34] ss:$8 sps:$4 sm:$0xff]   ;;  %v1838_v54 = vld [vmem:[#allocation7 + $0x70] ss:$8 sps:$4 sm:$0xff]   ;;  %v1839_v55 = vld [vmem:[#allocation7 + $0x84] ss:$8 sps:$4 sm:$0xff]  }
  0x7c   : > { %677 = vmatprep.subr.bf16.mxu0 %v1728_v6  ;;  %1167 = vmatpush1.bf16.xpose.msra.mxu1 %v1813_v31  ;;  %v1778_v56 = vld [vmem:[%s2244_s9 + $0x30] ss:$8 sps:$4 sm:$0xff]   ;;  %v1779_v57 = vld [vmem:[%s2244_s9 + $0x44] ss:$8 sps:$4 sm:$0xff]   ;;  %v1841_v58 = vld [vmem:[#allocation7 + $0x80] ss:$8 sps:$4 sm:$0xff]  }
  0x7d   : > { %1168 = vmatprep.subr.bf16.mxu1 %v1815_v34  ;;  %v1842_v59 = vld [vmem:[#allocation7 + $0x94] ss:$8 sps:$4 sm:$0xff]   ;;  %v1781_v60 = vld [vmem:[%s2244_s9 + $0x40] ss:$8 sps:$4 sm:$0xff]   ;;  %v1844_v62 = vld [vmem:[#allocation7 + $0x90] ss:$8 sps:$4 sm:$0xff]  }
  0x7e   : > { %v1782_v61 = vld [vmem:[%s2244_s9 + $0x54] ss:$8 sps:$4 sm:$0xff]   ;;  %v1845_v63 = vld [vmem:[#allocation7 + $0xa4] ss:$8 sps:$4 sm:$0xff]   ;;  %v1784_v0 = vld [vmem:[%s2244_s9 + $0x50] ss:$8 sps:$4 sm:$0xff]  }
  0x7f   : > { %v1785_v1 = vld [vmem:[%s2244_s9 + $0x64] ss:$8 sps:$4 sm:$0xff]   ;;  %v1847_v2 = vld [vmem:[#allocation7 + $0xa0] ss:$8 sps:$4 sm:$0xff]   ;;  %v1848_v3 = vld [vmem:[#allocation7 + $0xb4] ss:$8 sps:$4 sm:$0xff]  }
  0x80   : > { %v1787_v4 = vld [vmem:[%s2244_s9 + $0x60] ss:$8 sps:$4 sm:$0xff]   ;;  %v1788_v5 = vld [vmem:[%s2244_s9 + $0x74] ss:$8 sps:$4 sm:$0xff]   ;;  %v1850_v6 = vld [vmem:[#allocation7 + $0xb0] ss:$8 sps:$4 sm:$0xff]  }
  0x81   : > { %v1851_v7 = vld [vmem:[#allocation7 + $0xc4] ss:$8 sps:$4 sm:$0xff]   ;;  %v1811_v26 = vld [vmem:[%s2244_s9 + $0xd4] ss:$8 sps:$4 sm:$0xff]   ;;  %v1814_v27 = vld [vmem:[%s2244_s9 + $0xd0] ss:$8 sps:$4 sm:$0xff]  }
  0x82   : > { %v1823_v30 = vld [vmem:[%s2244_s9 + $0xf4] ss:$8 sps:$4 sm:$0xff]   ;;  %v1826_v31 = vld [vmem:[%s2244_s9 + $0xf0] ss:$8 sps:$4 sm:$0xff]   ;;  %s1541_s10 = sshll.u32 %s2240_s14, 9  ;;  %s1647_s12 = sshll.u32 %s2080_s22, 13 }
  0x83   : > { %678 = vmatpush1.bf16.xpose.msra.mxu0 %v1730_v8  ;;  %v1790_v8 = vld [vmem:[%s2244_s9 + $0x70] ss:$8 sps:$4 sm:$0xff]   ;;  %s2379_s28 = scalar_lea.vmem [#allocation8], %s1541_s10  ;;  %s2508_s17 = scalar_lea.hbm %s2563_s5, %s1647_s12 }
  0x84   : > { %679 = vmatprep.subr.bf16.mxu0 %v1731_v9  ;;  %1169 = vmatpush1.bf16.xpose.msra.mxu1 %v1819_v35  ;;  %v1791_v9 = vld [vmem:[%s2244_s9 + $0x84] ss:$8 sps:$4 sm:$0xff]   ;;  %v339_v35 = vld [vmem:[%s2560_s2] sm:$0x3]  ;;  %s1436_s13 = sshll.u32 %s2379_s28, 4  ;;  %s1422_s22 = scalar_lea.sflag [#allocation4], %s2240_s14  ;;  %s2510_s13 = int_to_ptr.vmem [resolvable:$true] %s1436_s13 }
  0x85   : > { %1170 = vmatprep.subr.bf16.mxu1 %v1821_v38  ;;  %s1949_s7 = scalar_lea.vmem %s2510_s13, 8192  ;;  %p2577_p0 = scmp.ne.s32.totalorder %s2572_s23, 0 }
  0x86   : > { %p1950_p11 = scmp.ne.s32.totalorder %s2510_s13, %s1949_s7  ;;  %s2026_s6 = smov [#allocation8]  }
  0x87   : > { %s1953_s8 = sshll.u32 %s2026_s6, 4  ;;  %s1954_s8 = int_to_ptr.vmem [resolvable:$false] %s1953_s8 }
  0x88   : > { %p1951_p2 = pnand %p1950_p11, %p2577_p0  ;;  %p1956_p7 = scmp.lt.s32.totalorder %s2510_s13, %s1954_s8 }
  0x8a   : > { %p1952_p3 = pneg %p1951_p2 }
  0x8b   : > { %680 = vmatpush1.bf16.xpose.msra.mxu0 %v1733_v10  ;;  %v1853_v10 = vld [vmem:[#allocation7 + $0xc0] ss:$8 sps:$4 sm:$0xff]  }
  0x8c   : > { %681 = vmatprep.subr.bf16.mxu0 %v1734_v11  ;;  %1171 = vmatpush1.bf16.xpose.msra.mxu1 %v1825_v39  ;;  %v1854_v11 = vld [vmem:[#allocation7 + $0xd4] ss:$8 sps:$4 sm:$0xff]  }
  0x8d   : > { %1172 = vmatprep.subr.bf16.mxu1 %v1827_v41 }
  0x93   : > { %682 = vmatpush1.bf16.xpose.msra.mxu0 %v1736_v12  ;;  %v1793_v12 = vld [vmem:[%s2244_s9 + $0x80] ss:$8 sps:$4 sm:$0xff]  }
  0x94   : > { %683 = vmatprep.subr.bf16.mxu0 %v1737_v13  ;;  %1173 = vmatpush1.bf16.xpose.msra.mxu1 %v1829_v42  ;;  %v1794_v13 = vld [vmem:[%s2244_s9 + $0x94] ss:$8 sps:$4 sm:$0xff]  }
  0x95   : > { %1174 = vmatprep.subr.bf16.mxu1 %v1830_v43 }
  0x9b   : > { %684 = vmatpush1.bf16.xpose.msra.mxu0 %v1739_v14  ;;  %v1856_v14 = vld [vmem:[#allocation7 + $0xd0] ss:$8 sps:$4 sm:$0xff]  }
  0x9c   : > { %685 = vmatprep.subr.bf16.mxu0 %v1740_v15  ;;  %1175 = vmatpush1.bf16.xpose.msra.mxu1 %v1832_v46  ;;  %v1857_v15 = vld [vmem:[#allocation7 + $0xe4] ss:$8 sps:$4 sm:$0xff]  }
  0x9d   : > { %1176 = vmatprep.subr.bf16.mxu1 %v1833_v47 }
  0xa3   : > { %686 = vmatpush1.bf16.xpose.msra.mxu0 %v1742_v16  ;;  %v1796_v16 = vld [vmem:[%s2244_s9 + $0x90] ss:$8 sps:$4 sm:$0xff]  }
  0xa4   : > { %687 = vmatprep.subr.bf16.mxu0 %v1743_v17  ;;  %1177 = vmatpush1.bf16.xpose.msra.mxu1 %v1835_v50  ;;  %v1797_v17 = vld [vmem:[%s2244_s9 + $0xa4] ss:$8 sps:$4 sm:$0xff]  }
  0xa5   : > { %1178 = vmatprep.subr.bf16.mxu1 %v1836_v51 }
  0xab   : > { %688 = vmatpush1.bf16.xpose.msra.mxu0 %v1745_v18  ;;  %v1859_v18 = vld [vmem:[#allocation7 + $0xe0] ss:$8 sps:$4 sm:$0xff]  }
  0xac   : > { %689 = vmatprep.subr.bf16.mxu0 %v1746_v19  ;;  %1179 = vmatpush1.bf16.xpose.msra.mxu1 %v1838_v54  ;;  %v1799_v19 = vld [vmem:[%s2244_s9 + $0xa0] ss:$8 sps:$4 sm:$0xff]  }
  0xad   : > { %1180 = vmatprep.subr.bf16.mxu1 %v1839_v55 }
  0xb3   : > { %690 = vmatpush1.bf16.xpose.msra.mxu0 %v1748_v20  ;;  %v1800_v20 = vld [vmem:[%s2244_s9 + $0xb4] ss:$8 sps:$4 sm:$0xff]  }
  0xb4   : > { %691 = vmatprep.subr.bf16.mxu0 %v1749_v21  ;;  %1181 = vmatpush1.bf16.xpose.msra.mxu1 %v1841_v58  ;;  %v1802_v21 = vld [vmem:[%s2244_s9 + $0xb0] ss:$8 sps:$4 sm:$0xff]  }
  0xb5   : > { %1182 = vmatprep.subr.bf16.mxu1 %v1842_v59 }
  0xbb   : > { %692 = vmatpush1.bf16.xpose.msra.mxu0 %v1751_v22  ;;  %v1860_v22 = vld [vmem:[#allocation7 + $0xf4] ss:$8 sps:$4 sm:$0xff]  }
  0xbc   : > { %693 = vmatprep.subr.bf16.mxu0 %v1752_v23  ;;  %1183 = vmatpush1.bf16.xpose.msra.mxu1 %v1844_v62  ;;  %v1805_v23 = vld [vmem:[%s2244_s9 + $0xc4] ss:$8 sps:$4 sm:$0xff]  }
  0xbd   : > { %1184 = vmatprep.subr.bf16.mxu1 %v1845_v63 }
  0xc3   : > { %694 = vmatpush1.bf16.xpose.msra.mxu0 %v1754_v24  ;;  %v1862_v24 = vld [vmem:[#allocation7 + $0xf0] ss:$8 sps:$4 sm:$0xff]  }
  0xc4   : > { %695 = vmatprep.subr.bf16.mxu0 %v1755_v25  ;;  %1185 = vmatpush1.bf16.xpose.msra.mxu1 %v1847_v2  ;;  %v1808_v25 = vld [vmem:[%s2244_s9 + $0xc0] ss:$8 sps:$4 sm:$0xff]  }
  0xc5   : > { %1186 = vmatprep.subr.bf16.mxu1 %v1848_v3 }
  0xcb   : > { %696 = vmatpush1.bf16.xpose.msra.mxu0 %v1757_v28  ;;  %v1817_v28 = vld [vmem:[%s2244_s9 + $0xe4] ss:$8 sps:$4 sm:$0xff]  }
  0xcc   : > { %697 = vmatprep.subr.bf16.mxu0 %v1758_v29  ;;  %1187 = vmatpush1.bf16.xpose.msra.mxu1 %v1850_v6  ;;  %v1820_v29 = vld [vmem:[%s2244_s9 + $0xe0] ss:$8 sps:$4 sm:$0xff]   ;;  %s1955_s9 = scalar_lea.vmem %s1954_s8, 16384 }
  0xcd   : > { %1188 = vmatprep.subr.bf16.mxu1 %v1851_v7  ;;  %p1957_p9 = scmp.lt.s32.totalorder %s1955_s9, %s1949_s7 }
  0xcf   : > { %p1958_p12 = por %p1957_p9, %p1956_p7 }
  0xd1   : > { %p1959_p1 = pnand %p1958_p12, %p1952_p3 }
  0xd3   : > { %698 = vmatpush1.bf16.xpose.msra.mxu0 %v1760_v32  ;;  %v341_v32 = vlaneseq }
  0xd4   : > { %699 = vmatprep.subr.bf16.mxu0 %v1761_v33  ;;  %1189 = vmatpush1.bf16.xpose.msra.mxu1 %v1853_v10 }
  0xd5   : > { %1190 = vmatprep.subr.bf16.mxu1 %v1854_v11  ;;  %v2286_v33 = vshrl.u32 %v341_v32, 7 }
  0xd7   : > { %v343_v34 = vsub.s32 0, %v2286_v33 }
  0xdb   : > { %700 = vmatpush1.bf16.xpose.msra.mxu0 %v1763_v36  ;;  %v347_v36 = vsub.s32 1, %v2286_v33 }
  0xdc   : > { %701 = vmatprep.subr.bf16.mxu0 %v1764_v37  ;;  %1191 = vmatpush1.bf16.xpose.msra.mxu1 %v1856_v14  ;;  %v2295_v37 = vrot.slane %v339_v35, %v343_v34 }
  0xdd   : > { %1192 = vmatprep.subr.bf16.mxu1 %v1857_v15  ;;  %v2299_v38 = vrot.slane %v339_v35, %v347_v36 }
  0xe3   : > { %702 = vmatpush1.bf16.xpose.msra.mxu0 %v1766_v40 }
  0xe4   : > { %1193 = vmatpush1.bf16.xpose.msra.mxu1 %v1859_v18 }
  0xe5   : > { %1194 = vmatprep.subr.bf16.mxu1 %v1860_v22 }
  0xea   : > { %704 = vmatmul.mubr.bf16.vlgmr.msra.gmra.mrb[0].mxu0 %v1767_v44 }
  0xeb   : > { %713 = vmatprep.mubr.bf16.mxu0 %v1770_v45 }
  0xec   : > { %1195 = vmatpush1.bf16.xpose.msra.mxu1 %v1862_v24 }
  0xf2   : > { %714 = vmatmul.mubr.bf16.gmra.mrb[4].mxu0 %v1772_v48 }
  0xf3   : > { %723 = vmatprep.mubr.bf16.mxu0 %v1773_v49 }
  0xfa   : > { %724 = vmatmul.mubr.bf16.gmra.mrb[8].mxu0 %v1775_v52 }
  0xfb   : > { %733 = vmatprep.mubr.bf16.mxu0 %v1776_v53 }
 0x102   : > { %734 = vmatmul.mubr.bf16.gmra.mrb[12].mxu0 %v1778_v56 }
 0x103   : > { %743 = vmatprep.mubr.bf16.mxu0 %v1779_v57 }
 0x10a   : > { %744 = vmatmul.mubr.bf16.gmra.mrb[16].mxu0 %v1781_v60 }
 0x10b   : > { %753 = vmatprep.mubr.bf16.mxu0 %v1782_v61 }
 0x112   : > { %754 = vmatmul.mubr.bf16.gmra.mrb[20].mxu0 %v1784_v0 }
 0x113   : > { %763 = vmatprep.mubr.bf16.mxu0 %v1785_v1 }
 0x11a   : > { %764 = vmatmul.mubr.bf16.gmra.mrb[24].mxu0 %v1787_v4 }
 0x11b   : > { %773 = vmatprep.mubr.bf16.mxu0 %v1788_v5 }
 0x122   : > { %774 = vmatmul.mubr.bf16.gmra.mrb[28].mxu0 %v1790_v8 }
 0x123   : > { %783 = vmatprep.mubr.bf16.mxu0 %v1791_v9 }
 0x12a   : > { %784 = vmatmul.mubr.bf16.gmra.mrb[32].mxu0 %v1793_v12 }
 0x12b   : > { %793 = vmatprep.mubr.bf16.mxu0 %v1794_v13 }
 0x132   : > { %794 = vmatmul.mubr.bf16.gmra.mrb[36].mxu0 %v1796_v16 }
 0x133   : > { %803 = vmatprep.mubr.bf16.mxu0 %v1797_v17 }
 0x13a   : > { %804 = vmatmul.mubr.bf16.gmra.mrb[40].mxu0 %v1799_v19 }
 0x13b   : > { %813 = vmatprep.mubr.bf16.mxu0 %v1800_v20 }
 0x142   : > { %814 = vmatmul.mubr.bf16.gmra.mrb[44].mxu0 %v1802_v21 }
 0x143   : > { %823 = vmatprep.mubr.bf16.mxu0 %v1805_v23 }
 0x14a   : > { %824 = vmatmul.mubr.bf16.gmra.mrb[48].mxu0 %v1808_v25 }
 0x14b   : > { %833 = vmatprep.mubr.bf16.mxu0 %v1811_v26 }
 0x152   : > { %834 = vmatmul.mubr.bf16.gmra.mrb[52].mxu0 %v1814_v27 }
 0x153   : > { %843 = vmatprep.mubr.bf16.mxu0 %v1817_v28 }
 0x15a   : > { %844 = vmatmul.mubr.bf16.gmra.mrb[56].mxu0 %v1820_v29 }
 0x15b   : > { %853 = vmatprep.mubr.bf16.mxu0 %v1823_v30 }
 0x162   : > { %854 = vmatmul.mubr.bf16.gmra.mrb[60].mxu0 %v1826_v31 }
 0x1bd   : > { %v705_v39 = vpop.f32.mrb[0].mxu0 }
 0x1be   : > { %v706_v40 = vadd.f32 %v705_v39, %v2295_v37  ;;  %v707_v41 = vpop.f32.mrb[1].mxu0 }
 0x1bf   : > { %v708_v42 = vadd.f32 %v707_v41, %v2299_v38  ;;  %v709_v43 = vpop.f32.mrb[2].mxu0 }
 0x1c0   : > { %v710_v44 = vadd.f32 %v709_v43, %v2295_v37  ;;  %v711_v45 = vpop.f32.mrb[3].mxu0  ;;  %v864_v47 = vmax.f32 %v706_v40, 0.0 }
 0x1c1   : > { %v712_v46 = vadd.f32 %v711_v45, %v2299_v38  ;;  %v865_v49 = vmax.f32 %v708_v42, 0.0 }
 0x1c2   : > { %v866_v48 = vmax.f32 %v710_v44, 0.0 }
 0x1c3   : > { %v867_v50 = vmax.f32 %v712_v46, 0.0 }
 0x1c4   : > { %v928_v51 = vpack.c.bf16 %v866_v48, %v864_v47 }
 0x1c5   : > { %v715_v52 = vpop.f32.mrb[4].mxu0  ;;  %v929_v53 = vpack.c.bf16 %v867_v50, %v865_v49 }
 0x1c6   : > { %v716_v54 = vadd.f32 %v715_v52, %v2295_v37  ;;  %v717_v55 = vpop.f32.mrb[5].mxu0 }
 0x1c7   : > { %v718_v56 = vadd.f32 %v717_v55, %v2299_v38  ;;  %v719_v57 = vpop.f32.mrb[6].mxu0  ;;  %1196 = vmatprep.mubr.bf16.mxu1 %v929_v53 }
 0x1c8   : > { %v720_v58 = vadd.f32 %v719_v57, %v2295_v37  ;;  %v721_v59 = vpop.f32.mrb[7].mxu0  ;;  %1197 = vmatmul.mubr.bf16.vlgmr.msra.gmra.mrb[0].mxu1 %v928_v51  ;;  %v868_v61 = vmax.f32 %v716_v54, 0.0 }
 0x1c9   : > { %v722_v60 = vadd.f32 %v721_v59, %v2299_v38  ;;  %v869_v63 = vmax.f32 %v718_v56, 0.0 }
 0x1ca   : > { %v870_v62 = vmax.f32 %v720_v58, 0.0 }
 0x1cb   : > { %v871_v0 = vmax.f32 %v722_v60, 0.0 }
 0x1cc   : > { %v930_v1 = vpack.c.bf16 %v870_v62, %v868_v61 }
 0x1cd   : > { %v931_v2 = vpack.c.bf16 %v871_v0, %v869_v63  ;;  %v725_v3 = vpop.f32.mrb[8].mxu0 }
 0x1ce   : > { %v726_v4 = vadd.f32 %v725_v3, %v2295_v37  ;;  %v727_v5 = vpop.f32.mrb[9].mxu0 }
 0x1cf   : > { %v728_v6 = vadd.f32 %v727_v5, %v2299_v38  ;;  %v729_v7 = vpop.f32.mrb[10].mxu0  ;;  %1206 = vmatprep.mubr.bf16.mxu1 %v931_v2 }
 0x1d0   : > { %v730_v8 = vadd.f32 %v729_v7, %v2295_v37  ;;  %v731_v9 = vpop.f32.mrb[11].mxu0  ;;  %1207 = vmatmul.mubr.bf16.gmra.mrb[4].mxu1 %v930_v1  ;;  %v872_v11 = vmax.f32 %v726_v4, 0.0 }
 0x1d1   : > { %v732_v10 = vadd.f32 %v731_v9, %v2299_v38  ;;  %v873_v13 = vmax.f32 %v728_v6, 0.0 }
 0x1d2   : > { %v874_v12 = vmax.f32 %v730_v8, 0.0 }
 0x1d3   : > { %v875_v14 = vmax.f32 %v732_v10, 0.0 }
 0x1d4   : > { %v932_v15 = vpack.c.bf16 %v874_v12, %v872_v11 }
 0x1d5   : > { %v933_v16 = vpack.c.bf16 %v875_v14, %v873_v13  ;;  %v735_v17 = vpop.f32.mrb[12].mxu0 }
 0x1d6   : > { %v736_v18 = vadd.f32 %v735_v17, %v2295_v37  ;;  %v737_v19 = vpop.f32.mrb[13].mxu0 }
 0x1d7   : > { %v738_v20 = vadd.f32 %v737_v19, %v2299_v38  ;;  %v739_v21 = vpop.f32.mrb[14].mxu0  ;;  %1216 = vmatprep.mubr.bf16.mxu1 %v933_v16 }
 0x1d8   : > { %v740_v22 = vadd.f32 %v739_v21, %v2295_v37  ;;  %v741_v23 = vpop.f32.mrb[15].mxu0  ;;  %1217 = vmatmul.mubr.bf16.gmra.mrb[8].mxu1 %v932_v15  ;;  %v876_v25 = vmax.f32 %v736_v18, 0.0 }
 0x1d9   : > { %v742_v24 = vadd.f32 %v741_v23, %v2299_v38  ;;  %v877_v27 = vmax.f32 %v738_v20, 0.0 }
 0x1da   : > { %v878_v26 = vmax.f32 %v740_v22, 0.0 }
 0x1db   : > { %v879_v28 = vmax.f32 %v742_v24, 0.0 }
 0x1dc   : > { %v934_v29 = vpack.c.bf16 %v878_v26, %v876_v25 }
 0x1dd   : > { %v935_v30 = vpack.c.bf16 %v879_v28, %v877_v27  ;;  %v745_v31 = vpop.f32.mrb[16].mxu0 }
 0x1de   : > { %v746_v32 = vadd.f32 %v745_v31, %v2295_v37  ;;  %v747_v35 = vpop.f32.mrb[17].mxu0 }
 0x1df   : > { %v748_v39 = vadd.f32 %v747_v35, %v2299_v38  ;;  %v749_v40 = vpop.f32.mrb[18].mxu0  ;;  %1226 = vmatprep.mubr.bf16.mxu1 %v935_v30 }
 0x1e0   : > { %v750_v41 = vadd.f32 %v749_v40, %v2295_v37  ;;  %v751_v42 = vpop.f32.mrb[19].mxu0  ;;  %1227 = vmatmul.mubr.bf16.gmra.mrb[12].mxu1 %v934_v29  ;;  %v880_v44 = vmax.f32 %v746_v32, 0.0 }
 0x1e1   : > { %v752_v43 = vadd.f32 %v751_v42, %v2299_v38  ;;  %v881_v46 = vmax.f32 %v748_v39, 0.0 }
 0x1e2   : > { %v882_v45 = vmax.f32 %v750_v41, 0.0 }
 0x1e3   : > { %v883_v47 = vmax.f32 %v752_v43, 0.0 }
 0x1e4   : > { %v936_v48 = vpack.c.bf16 %v882_v45, %v880_v44 }
 0x1e5   : > { %v937_v49 = vpack.c.bf16 %v883_v47, %v881_v46  ;;  %v755_v50 = vpop.f32.mrb[20].mxu0 }
 0x1e6   : > { %v756_v51 = vadd.f32 %v755_v50, %v2295_v37  ;;  %v757_v52 = vpop.f32.mrb[21].mxu0 }
 0x1e7   : > { %v758_v53 = vadd.f32 %v757_v52, %v2299_v38  ;;  %v759_v54 = vpop.f32.mrb[22].mxu0  ;;  %1236 = vmatprep.mubr.bf16.mxu1 %v937_v49 }
 0x1e8   : > { %v760_v55 = vadd.f32 %v759_v54, %v2295_v37  ;;  %v761_v56 = vpop.f32.mrb[23].mxu0  ;;  %1237 = vmatmul.mubr.bf16.gmra.mrb[16].mxu1 %v936_v48  ;;  %v884_v58 = vmax.f32 %v756_v51, 0.0 }
 0x1e9   : > { %v762_v57 = vadd.f32 %v761_v56, %v2299_v38  ;;  %v885_v60 = vmax.f32 %v758_v53, 0.0 }
 0x1ea   : > { %v886_v59 = vmax.f32 %v760_v55, 0.0 }
 0x1eb   : > { %v887_v61 = vmax.f32 %v762_v57, 0.0 }
 0x1ec   : > { %v938_v62 = vpack.c.bf16 %v886_v59, %v884_v58 }
 0x1ed   : > { %v939_v63 = vpack.c.bf16 %v887_v61, %v885_v60  ;;  %v765_v0 = vpop.f32.mrb[24].mxu0 }
 0x1ee   : > { %v766_v1 = vadd.f32 %v765_v0, %v2295_v37  ;;  %v767_v2 = vpop.f32.mrb[25].mxu0 }
 0x1ef   : > { %v768_v3 = vadd.f32 %v767_v2, %v2299_v38  ;;  %v769_v4 = vpop.f32.mrb[26].mxu0  ;;  %1246 = vmatprep.mubr.bf16.mxu1 %v939_v63 }
 0x1f0   : > { %v770_v5 = vadd.f32 %v769_v4, %v2295_v37  ;;  %v771_v6 = vpop.f32.mrb[27].mxu0  ;;  %1247 = vmatmul.mubr.bf16.gmra.mrb[20].mxu1 %v938_v62  ;;  %v888_v8 = vmax.f32 %v766_v1, 0.0 }
 0x1f1   : > { %v772_v7 = vadd.f32 %v771_v6, %v2299_v38  ;;  %v889_v10 = vmax.f32 %v768_v3, 0.0 }
 0x1f2   : > { %v890_v9 = vmax.f32 %v770_v5, 0.0 }
 0x1f3   : > { %v891_v11 = vmax.f32 %v772_v7, 0.0 }
 0x1f4   : > { %v940_v12 = vpack.c.bf16 %v890_v9, %v888_v8 }
 0x1f5   : > { %v941_v13 = vpack.c.bf16 %v891_v11, %v889_v10  ;;  %v775_v14 = vpop.f32.mrb[28].mxu0 }
 0x1f6   : > { %v776_v15 = vadd.f32 %v775_v14, %v2295_v37  ;;  %v777_v16 = vpop.f32.mrb[29].mxu0 }
 0x1f7   : > { %v778_v17 = vadd.f32 %v777_v16, %v2299_v38  ;;  %v779_v18 = vpop.f32.mrb[30].mxu0  ;;  %1256 = vmatprep.mubr.bf16.mxu1 %v941_v13 }
 0x1f8   : > { %v780_v19 = vadd.f32 %v779_v18, %v2295_v37  ;;  %v781_v20 = vpop.f32.mrb[31].mxu0  ;;  %1257 = vmatmul.mubr.bf16.gmra.mrb[24].mxu1 %v940_v12  ;;  %v892_v22 = vmax.f32 %v776_v15, 0.0 }
 0x1f9   : > { %v782_v21 = vadd.f32 %v781_v20, %v2299_v38  ;;  %v893_v24 = vmax.f32 %v778_v17, 0.0 }
 0x1fa   : > { %v894_v23 = vmax.f32 %v780_v19, 0.0 }
 0x1fb   : > { %v895_v25 = vmax.f32 %v782_v21, 0.0 }
 0x1fc   : > { %v942_v26 = vpack.c.bf16 %v894_v23, %v892_v22 }
 0x1fd   : > { %v943_v27 = vpack.c.bf16 %v895_v25, %v893_v24  ;;  %v785_v28 = vpop.f32.mrb[32].mxu0 }
 0x1fe   : > { %v786_v29 = vadd.f32 %v785_v28, %v2295_v37  ;;  %v787_v30 = vpop.f32.mrb[33].mxu0 }
 0x1ff   : > { %v788_v31 = vadd.f32 %v787_v30, %v2299_v38  ;;  %v789_v32 = vpop.f32.mrb[34].mxu0  ;;  %1266 = vmatprep.mubr.bf16.mxu1 %v943_v27 }
 0x200   : > { %v790_v35 = vadd.f32 %v789_v32, %v2295_v37  ;;  %v791_v39 = vpop.f32.mrb[35].mxu0  ;;  %1267 = vmatmul.mubr.bf16.gmra.mrb[28].mxu1 %v942_v26  ;;  %v896_v41 = vmax.f32 %v786_v29, 0.0 }
 0x201   : > { %v792_v40 = vadd.f32 %v791_v39, %v2299_v38  ;;  %v897_v43 = vmax.f32 %v788_v31, 0.0 }
 0x202   : > { %v898_v42 = vmax.f32 %v790_v35, 0.0 }
 0x203   : > { %v899_v44 = vmax.f32 %v792_v40, 0.0 }
 0x204   : > { %v944_v45 = vpack.c.bf16 %v898_v42, %v896_v41 }
 0x205   : > { %v945_v46 = vpack.c.bf16 %v899_v44, %v897_v43  ;;  %v795_v47 = vpop.f32.mrb[36].mxu0 }
 0x206   : > { %v796_v48 = vadd.f32 %v795_v47, %v2295_v37  ;;  %v797_v49 = vpop.f32.mrb[37].mxu0 }
 0x207   : > { %v798_v50 = vadd.f32 %v797_v49, %v2299_v38  ;;  %v799_v51 = vpop.f32.mrb[38].mxu0  ;;  %1276 = vmatprep.mubr.bf16.mxu1 %v945_v46 }
 0x208   : > { %v800_v52 = vadd.f32 %v799_v51, %v2295_v37  ;;  %v801_v53 = vpop.f32.mrb[39].mxu0  ;;  %1277 = vmatmul.mubr.bf16.gmra.mrb[32].mxu1 %v944_v45  ;;  %v900_v55 = vmax.f32 %v796_v48, 0.0 }
 0x209   : > { %v802_v54 = vadd.f32 %v801_v53, %v2299_v38  ;;  %v901_v57 = vmax.f32 %v798_v50, 0.0 }
 0x20a   : > { %v902_v56 = vmax.f32 %v800_v52, 0.0 }
 0x20b   : > { %v903_v58 = vmax.f32 %v802_v54, 0.0 }
 0x20c   : > { %v946_v59 = vpack.c.bf16 %v902_v56, %v900_v55 }
 0x20d   : > { %v947_v60 = vpack.c.bf16 %v903_v58, %v901_v57  ;;  %v805_v61 = vpop.f32.mrb[40].mxu0 }
 0x20e   : > { %v806_v62 = vadd.f32 %v805_v61, %v2295_v37  ;;  %v807_v63 = vpop.f32.mrb[41].mxu0 }
 0x20f   : > { %v808_v0 = vadd.f32 %v807_v63, %v2299_v38  ;;  %v809_v1 = vpop.f32.mrb[42].mxu0  ;;  %1286 = vmatprep.mubr.bf16.mxu1 %v947_v60 }
 0x210   : > { %v810_v2 = vadd.f32 %v809_v1, %v2295_v37  ;;  %v811_v3 = vpop.f32.mrb[43].mxu0  ;;  %1287 = vmatmul.mubr.bf16.gmra.mrb[36].mxu1 %v946_v59  ;;  %v904_v5 = vmax.f32 %v806_v62, 0.0 }
 0x211   : > { %v812_v4 = vadd.f32 %v811_v3, %v2299_v38  ;;  %v905_v7 = vmax.f32 %v808_v0, 0.0 }
 0x212   : > { %v906_v6 = vmax.f32 %v810_v2, 0.0 }
 0x213   : > { %v907_v8 = vmax.f32 %v812_v4, 0.0 }
 0x214   : > { %v948_v9 = vpack.c.bf16 %v906_v6, %v904_v5 }
 0x215   : > { %v949_v10 = vpack.c.bf16 %v907_v8, %v905_v7  ;;  %v815_v11 = vpop.f32.mrb[44].mxu0 }
 0x216   : > { %v816_v12 = vadd.f32 %v815_v11, %v2295_v37  ;;  %v817_v13 = vpop.f32.mrb[45].mxu0 }
 0x217   : > { %v818_v14 = vadd.f32 %v817_v13, %v2299_v38  ;;  %v819_v15 = vpop.f32.mrb[46].mxu0  ;;  %1296 = vmatprep.mubr.bf16.mxu1 %v949_v10 }
 0x218   : > { %v820_v16 = vadd.f32 %v819_v15, %v2295_v37  ;;  %v821_v17 = vpop.f32.mrb[47].mxu0  ;;  %1297 = vmatmul.mubr.bf16.gmra.mrb[40].mxu1 %v948_v9  ;;  %v908_v19 = vmax.f32 %v816_v12, 0.0 }
 0x219   : > { %v822_v18 = vadd.f32 %v821_v17, %v2299_v38  ;;  %v909_v21 = vmax.f32 %v818_v14, 0.0 }
 0x21a   : > { %v910_v20 = vmax.f32 %v820_v16, 0.0 }
 0x21b   : > { %v911_v22 = vmax.f32 %v822_v18, 0.0 }
 0x21c   : > { %v950_v23 = vpack.c.bf16 %v910_v20, %v908_v19 }
 0x21d   : > { %v951_v24 = vpack.c.bf16 %v911_v22, %v909_v21  ;;  %v825_v25 = vpop.f32.mrb[48].mxu0  ;;  %v992_v22 = vld [vmem:[%s2562_s4] sm:$0x3] }
 0x21e   : > { %v826_v26 = vadd.f32 %v825_v25, %v2295_v37  ;;  %v827_v27 = vpop.f32.mrb[49].mxu0 }
 0x21f   : > { %v828_v28 = vadd.f32 %v827_v27, %v2299_v38  ;;  %v829_v29 = vpop.f32.mrb[50].mxu0  ;;  %1306 = vmatprep.mubr.bf16.mxu1 %v951_v24 }
 0x220   : > { %v830_v30 = vadd.f32 %v829_v29, %v2295_v37  ;;  %v831_v31 = vpop.f32.mrb[51].mxu0  ;;  %1307 = vmatmul.mubr.bf16.gmra.mrb[44].mxu1 %v950_v23  ;;  %v912_v35 = vmax.f32 %v826_v26, 0.0 }
 0x221   : > { %v832_v32 = vadd.f32 %v831_v31, %v2299_v38  ;;  %v913_v40 = vmax.f32 %v828_v28, 0.0 }
 0x222   : > { %v914_v39 = vmax.f32 %v830_v30, 0.0 }
 0x223   : > { %v915_v41 = vmax.f32 %v832_v32, 0.0 }
 0x224   : > { %v952_v42 = vpack.c.bf16 %v914_v39, %v912_v35 }
 0x225   : > { %v953_v43 = vpack.c.bf16 %v915_v41, %v913_v40  ;;  %v835_v44 = vpop.f32.mrb[52].mxu0 }
 0x226   : > { %v836_v45 = vadd.f32 %v835_v44, %v2295_v37  ;;  %v837_v46 = vpop.f32.mrb[53].mxu0 }
 0x227   : > { %v838_v47 = vadd.f32 %v837_v46, %v2299_v38  ;;  %v839_v48 = vpop.f32.mrb[54].mxu0  ;;  %1316 = vmatprep.mubr.bf16.mxu1 %v953_v43 }
 0x228   : > { %v840_v49 = vadd.f32 %v839_v48, %v2295_v37  ;;  %v841_v50 = vpop.f32.mrb[55].mxu0  ;;  %1317 = vmatmul.mubr.bf16.gmra.mrb[48].mxu1 %v952_v42  ;;  %v916_v52 = vmax.f32 %v836_v45, 0.0 }
 0x229   : > { %v842_v51 = vadd.f32 %v841_v50, %v2299_v38  ;;  %v917_v54 = vmax.f32 %v838_v47, 0.0 }
 0x22a   : > { %v918_v53 = vmax.f32 %v840_v49, 0.0 }
 0x22b   : > { %v919_v55 = vmax.f32 %v842_v51, 0.0 }
 0x22c   : > { %v954_v56 = vpack.c.bf16 %v918_v53, %v916_v52 }
 0x22d   : > { %v955_v57 = vpack.c.bf16 %v919_v55, %v917_v54  ;;  %v845_v58 = vpop.f32.mrb[56].mxu0 }
 0x22e   : > { %v846_v59 = vadd.f32 %v845_v58, %v2295_v37  ;;  %v847_v60 = vpop.f32.mrb[57].mxu0 }
 0x22f   : > { %v848_v61 = vadd.f32 %v847_v60, %v2299_v38  ;;  %v849_v62 = vpop.f32.mrb[58].mxu0  ;;  %1326 = vmatprep.mubr.bf16.mxu1 %v955_v57 }
 0x230   : > { %v850_v63 = vadd.f32 %v849_v62, %v2295_v37  ;;  %v851_v0 = vpop.f32.mrb[59].mxu0  ;;  %1327 = vmatmul.mubr.bf16.gmra.mrb[52].mxu1 %v954_v56  ;;  %v920_v2 = vmax.f32 %v846_v59, 0.0 }
 0x231   : > { %v852_v1 = vadd.f32 %v851_v0, %v2299_v38  ;;  %v921_v4 = vmax.f32 %v848_v61, 0.0 }
 0x232   : > { %v922_v3 = vmax.f32 %v850_v63, 0.0 }
 0x233   : > { %v923_v5 = vmax.f32 %v852_v1, 0.0 }
 0x234   : > { %v956_v6 = vpack.c.bf16 %v922_v3, %v920_v2 }
 0x235   : > { %v957_v7 = vpack.c.bf16 %v923_v5, %v921_v4  ;;  %v855_v8 = vpop.f32.mrb[60].mxu0 }
 0x236   : > { %v856_v9 = vadd.f32 %v855_v8, %v2295_v37  ;;  %v857_v10 = vpop.f32.mrb[61].mxu0 }
 0x237   : > { %v858_v11 = vadd.f32 %v857_v10, %v2299_v38  ;;  %v859_v12 = vpop.f32.mrb[62].mxu0  ;;  %1336 = vmatprep.mubr.bf16.mxu1 %v957_v7 }
 0x238   : > { %v860_v13 = vadd.f32 %v859_v12, %v2295_v37  ;;  %v861_v14 = vpop.f32.mrb[63].mxu0  ;;  %1337 = vmatmul.mubr.bf16.gmra.mrb[56].mxu1 %v956_v6  ;;  %v924_v16 = vmax.f32 %v856_v9, 0.0  ;;  %v2371_v37 = vrot.slane %v992_v22, %v343_v34 }
 0x239   : > { %v862_v15 = vadd.f32 %v861_v14, %v2299_v38  ;;  %v925_v18 = vmax.f32 %v858_v11, 0.0  ;;  %v2375_v38 = vrot.slane %v992_v22, %v347_v36 }
 0x23a   : > { %v926_v17 = vmax.f32 %v860_v13, 0.0 }
 0x23b   : > { %v927_v19 = vmax.f32 %v862_v15, 0.0 }
 0x23c   : > { %v958_v20 = vpack.c.bf16 %v926_v17, %v924_v16 }
 0x23d   : > { %v959_v21 = vpack.c.bf16 %v927_v19, %v925_v18 }
 0x23f   : > { %1346 = vmatprep.mubr.bf16.mxu1 %v959_v21 }
 0x240   : > { %1347 = vmatmul.mubr.bf16.gmra.mrb[60].mxu1 %v958_v20 }
 0x29b   : > { %v1198_v23 = vpop.f32.mrb[0].mxu1 }
 0x29c   : > { %v1199_v24 = vadd.f32 %v1198_v23, %v2371_v37  ;;  %v1200_v25 = vpop.f32.mrb[1].mxu1 }
 0x29d   : > { %v1201_v26 = vadd.f32 %v1200_v25, %v2375_v38  ;;  %v1202_v27 = vpop.f32.mrb[2].mxu1 }
 0x29e   : > { %1357 = vst [vmem:[%s2379_s28] sm:$0xff] %v1199_v24  ;;  %v1203_v33 = vadd.f32 %v1202_v27, %v2371_v37  ;;  %v1204_v34 = vpop.f32.mrb[3].mxu1 }
 0x29f   : > { %1358 = vst [vmem:[%s2379_s28 + $0x8] sm:$0xff] %v1201_v26  ;;  %v1205_v36 = vadd.f32 %v1204_v34, %v2375_v38 }
 0x2a0   : > { %1359 = vst [vmem:[%s2379_s28 + $0x10] sm:$0xff] %v1203_v33 }
 0x2a1   : > { %1360 = vst [vmem:[%s2379_s28 + $0x18] sm:$0xff] %v1205_v36 }
 0x2a3   : > { %v1208_v28 = vpop.f32.mrb[4].mxu1 }
 0x2a4   : > { %v1209_v29 = vadd.f32 %v1208_v28, %v2371_v37  ;;  %v1210_v30 = vpop.f32.mrb[5].mxu1 }
 0x2a5   : > { %v1211_v31 = vadd.f32 %v1210_v30, %v2375_v38  ;;  %v1212_v32 = vpop.f32.mrb[6].mxu1 }
 0x2a6   : > { %1361 = vst [vmem:[%s2379_s28 + $0x20] sm:$0xff] %v1209_v29  ;;  %v1213_v35 = vadd.f32 %v1212_v32, %v2371_v37  ;;  %v1214_v39 = vpop.f32.mrb[7].mxu1 }
 0x2a7   : > { %1362 = vst [vmem:[%s2379_s28 + $0x28] sm:$0xff] %v1211_v31  ;;  %v1215_v40 = vadd.f32 %v1214_v39, %v2375_v38 }
 0x2a8   : > { %1363 = vst [vmem:[%s2379_s28 + $0x30] sm:$0xff] %v1213_v35 }
 0x2a9   : > { %1364 = vst [vmem:[%s2379_s28 + $0x38] sm:$0xff] %v1215_v40 }
 0x2ab   : > { %v1218_v41 = vpop.f32.mrb[8].mxu1 }
 0x2ac   : > { %v1219_v42 = vadd.f32 %v1218_v41, %v2371_v37  ;;  %v1220_v43 = vpop.f32.mrb[9].mxu1 }
 0x2ad   : > { %v1221_v44 = vadd.f32 %v1220_v43, %v2375_v38  ;;  %v1222_v45 = vpop.f32.mrb[10].mxu1 }
 0x2ae   : > { %1365 = vst [vmem:[%s2379_s28 + $0x40] sm:$0xff] %v1219_v42  ;;  %v1223_v46 = vadd.f32 %v1222_v45, %v2371_v37  ;;  %v1224_v47 = vpop.f32.mrb[11].mxu1 }
 0x2af   : > { %1366 = vst [vmem:[%s2379_s28 + $0x48] sm:$0xff] %v1221_v44  ;;  %v1225_v48 = vadd.f32 %v1224_v47, %v2375_v38 }
 0x2b0   : > { %1367 = vst [vmem:[%s2379_s28 + $0x50] sm:$0xff] %v1223_v46 }
 0x2b1   : > { %1368 = vst [vmem:[%s2379_s28 + $0x58] sm:$0xff] %v1225_v48 }
 0x2b3   : > { %v1228_v49 = vpop.f32.mrb[12].mxu1 }
 0x2b4   : > { %v1229_v50 = vadd.f32 %v1228_v49, %v2371_v37  ;;  %v1230_v51 = vpop.f32.mrb[13].mxu1 }
 0x2b5   : > { %v1231_v52 = vadd.f32 %v1230_v51, %v2375_v38  ;;  %v1232_v53 = vpop.f32.mrb[14].mxu1 }
 0x2b6   : > { %1369 = vst [vmem:[%s2379_s28 + $0x60] sm:$0xff] %v1229_v50  ;;  %v1233_v54 = vadd.f32 %v1232_v53, %v2371_v37  ;;  %v1234_v55 = vpop.f32.mrb[15].mxu1 }
 0x2b7   : > { %1370 = vst [vmem:[%s2379_s28 + $0x68] sm:$0xff] %v1231_v52  ;;  %v1235_v56 = vadd.f32 %v1234_v55, %v2375_v38 }
 0x2b8   : > { %1371 = vst [vmem:[%s2379_s28 + $0x70] sm:$0xff] %v1233_v54 }
 0x2b9   : > { %1372 = vst [vmem:[%s2379_s28 + $0x78] sm:$0xff] %v1235_v56 }
 0x2bb   : > { %v1238_v57 = vpop.f32.mrb[16].mxu1 }
 0x2bc   : > { %v1239_v58 = vadd.f32 %v1238_v57, %v2371_v37  ;;  %v1240_v59 = vpop.f32.mrb[17].mxu1 }
 0x2bd   : > { %v1241_v60 = vadd.f32 %v1240_v59, %v2375_v38  ;;  %v1242_v61 = vpop.f32.mrb[18].mxu1 }
 0x2be   : > { %1373 = vst [vmem:[%s2379_s28 + $0x80] sm:$0xff] %v1239_v58  ;;  %v1243_v62 = vadd.f32 %v1242_v61, %v2371_v37  ;;  %v1244_v63 = vpop.f32.mrb[19].mxu1 }
 0x2bf   : > { %1374 = vst [vmem:[%s2379_s28 + $0x88] sm:$0xff] %v1241_v60  ;;  %v1245_v0 = vadd.f32 %v1244_v63, %v2375_v38 }
 0x2c0   : > { %1375 = vst [vmem:[%s2379_s28 + $0x90] sm:$0xff] %v1243_v62 }
 0x2c1   : > { %1376 = vst [vmem:[%s2379_s28 + $0x98] sm:$0xff] %v1245_v0 }
 0x2c3   : > { %v1248_v1 = vpop.f32.mrb[20].mxu1 }
 0x2c4   : > { %v1249_v2 = vadd.f32 %v1248_v1, %v2371_v37  ;;  %v1250_v3 = vpop.f32.mrb[21].mxu1 }
 0x2c5   : > { %v1251_v4 = vadd.f32 %v1250_v3, %v2375_v38  ;;  %v1252_v5 = vpop.f32.mrb[22].mxu1 }
 0x2c6   : > { %1377 = vst [vmem:[%s2379_s28 + $0xa0] sm:$0xff] %v1249_v2  ;;  %v1253_v6 = vadd.f32 %v1252_v5, %v2371_v37  ;;  %v1254_v7 = vpop.f32.mrb[23].mxu1 }
 0x2c7   : > { %1378 = vst [vmem:[%s2379_s28 + $0xa8] sm:$0xff] %v1251_v4  ;;  %v1255_v8 = vadd.f32 %v1254_v7, %v2375_v38 }
 0x2c8   : > { %1379 = vst [vmem:[%s2379_s28 + $0xb0] sm:$0xff] %v1253_v6 }
 0x2c9   : > { %1380 = vst [vmem:[%s2379_s28 + $0xb8] sm:$0xff] %v1255_v8 }
 0x2cb   : > { %v1258_v9 = vpop.f32.mrb[24].mxu1 }
 0x2cc   : > { %v1259_v10 = vadd.f32 %v1258_v9, %v2371_v37  ;;  %v1260_v11 = vpop.f32.mrb[25].mxu1 }
 0x2cd   : > { %v1261_v12 = vadd.f32 %v1260_v11, %v2375_v38  ;;  %v1262_v13 = vpop.f32.mrb[26].mxu1 }
 0x2ce   : > { %1381 = vst [vmem:[%s2379_s28 + $0xc0] sm:$0xff] %v1259_v10  ;;  %v1263_v14 = vadd.f32 %v1262_v13, %v2371_v37  ;;  %v1264_v15 = vpop.f32.mrb[27].mxu1 }
 0x2cf   : > { %1382 = vst [vmem:[%s2379_s28 + $0xc8] sm:$0xff] %v1261_v12  ;;  %v1265_v16 = vadd.f32 %v1264_v15, %v2375_v38 }
 0x2d0   : > { %1383 = vst [vmem:[%s2379_s28 + $0xd0] sm:$0xff] %v1263_v14 }
 0x2d1   : > { %1384 = vst [vmem:[%s2379_s28 + $0xd8] sm:$0xff] %v1265_v16 }
 0x2d3   : > { %v1268_v17 = vpop.f32.mrb[28].mxu1 }
 0x2d4   : > { %v1269_v18 = vadd.f32 %v1268_v17, %v2371_v37  ;;  %v1270_v19 = vpop.f32.mrb[29].mxu1 }
 0x2d5   : > { %v1271_v20 = vadd.f32 %v1270_v19, %v2375_v38  ;;  %v1272_v21 = vpop.f32.mrb[30].mxu1 }
 0x2d6   : > { %1385 = vst [vmem:[%s2379_s28 + $0xe0] sm:$0xff] %v1269_v18  ;;  %v1273_v22 = vadd.f32 %v1272_v21, %v2371_v37  ;;  %v1274_v23 = vpop.f32.mrb[31].mxu1 }
 0x2d7   : > { %1386 = vst [vmem:[%s2379_s28 + $0xe8] sm:$0xff] %v1271_v20  ;;  %v1275_v24 = vadd.f32 %v1274_v23, %v2375_v38 }
 0x2d8   : > { %1387 = vst [vmem:[%s2379_s28 + $0xf0] sm:$0xff] %v1273_v22 }
 0x2d9   : > { %1388 = vst [vmem:[%s2379_s28 + $0xf8] sm:$0xff] %v1275_v24 }
 0x2db   : > { %v1278_v25 = vpop.f32.mrb[32].mxu1 }
 0x2dc   : > { %v1279_v26 = vadd.f32 %v1278_v25, %v2371_v37  ;;  %v1280_v27 = vpop.f32.mrb[33].mxu1 }
 0x2dd   : > { %v1281_v33 = vadd.f32 %v1280_v27, %v2375_v38  ;;  %v1282_v34 = vpop.f32.mrb[34].mxu1 }
 0x2de   : > { %1389 = vst [vmem:[%s2379_s28 + $0x100] sm:$0xff] %v1279_v26  ;;  %v1283_v36 = vadd.f32 %v1282_v34, %v2371_v37  ;;  %v1284_v28 = vpop.f32.mrb[35].mxu1 }
 0x2df   : > { %1390 = vst [vmem:[%s2379_s28 + $0x108] sm:$0xff] %v1281_v33  ;;  %v1285_v29 = vadd.f32 %v1284_v28, %v2375_v38 }
 0x2e0   : > { %1391 = vst [vmem:[%s2379_s28 + $0x110] sm:$0xff] %v1283_v36 }
 0x2e1   : > { %1392 = vst [vmem:[%s2379_s28 + $0x118] sm:$0xff] %v1285_v29 }
 0x2e3   : > { %v1288_v30 = vpop.f32.mrb[36].mxu1 }
 0x2e4   : > { %v1289_v31 = vadd.f32 %v1288_v30, %v2371_v37  ;;  %v1290_v32 = vpop.f32.mrb[37].mxu1 }
 0x2e5   : > { %v1291_v35 = vadd.f32 %v1290_v32, %v2375_v38  ;;  %v1292_v39 = vpop.f32.mrb[38].mxu1 }
 0x2e6   : > { %1393 = vst [vmem:[%s2379_s28 + $0x120] sm:$0xff] %v1289_v31  ;;  %v1293_v40 = vadd.f32 %v1292_v39, %v2371_v37  ;;  %v1294_v41 = vpop.f32.mrb[39].mxu1 }
 0x2e7   : > { %1394 = vst [vmem:[%s2379_s28 + $0x128] sm:$0xff] %v1291_v35  ;;  %v1295_v42 = vadd.f32 %v1294_v41, %v2375_v38 }
 0x2e8   : > { %1395 = vst [vmem:[%s2379_s28 + $0x130] sm:$0xff] %v1293_v40 }
 0x2e9   : > { %1396 = vst [vmem:[%s2379_s28 + $0x138] sm:$0xff] %v1295_v42 }
 0x2eb   : > { %v1298_v43 = vpop.f32.mrb[40].mxu1 }
 0x2ec   : > { %v1299_v44 = vadd.f32 %v1298_v43, %v2371_v37  ;;  %v1300_v45 = vpop.f32.mrb[41].mxu1 }
 0x2ed   : > { %v1301_v46 = vadd.f32 %v1300_v45, %v2375_v38  ;;  %v1302_v47 = vpop.f32.mrb[42].mxu1 }
 0x2ee   : > { %1397 = vst [vmem:[%s2379_s28 + $0x140] sm:$0xff] %v1299_v44  ;;  %v1303_v48 = vadd.f32 %v1302_v47, %v2371_v37  ;;  %v1304_v49 = vpop.f32.mrb[43].mxu1 }
 0x2ef   : > { %1398 = vst [vmem:[%s2379_s28 + $0x148] sm:$0xff] %v1301_v46  ;;  %v1305_v50 = vadd.f32 %v1304_v49, %v2375_v38 }
 0x2f0   : > { %1399 = vst [vmem:[%s2379_s28 + $0x150] sm:$0xff] %v1303_v48 }
 0x2f1   : > { %1400 = vst [vmem:[%s2379_s28 + $0x158] sm:$0xff] %v1305_v50 }
 0x2f3   : > { %v1308_v51 = vpop.f32.mrb[44].mxu1 }
 0x2f4   : > { %v1309_v52 = vadd.f32 %v1308_v51, %v2371_v37  ;;  %v1310_v53 = vpop.f32.mrb[45].mxu1 }
 0x2f5   : > { %v1311_v54 = vadd.f32 %v1310_v53, %v2375_v38  ;;  %v1312_v55 = vpop.f32.mrb[46].mxu1 }
 0x2f6   : > { %1401 = vst [vmem:[%s2379_s28 + $0x160] sm:$0xff] %v1309_v52  ;;  %v1313_v56 = vadd.f32 %v1312_v55, %v2371_v37  ;;  %v1314_v57 = vpop.f32.mrb[47].mxu1 }
 0x2f7   : > { %1402 = vst [vmem:[%s2379_s28 + $0x168] sm:$0xff] %v1311_v54  ;;  %v1315_v58 = vadd.f32 %v1314_v57, %v2375_v38 }
 0x2f8   : > { %1403 = vst [vmem:[%s2379_s28 + $0x170] sm:$0xff] %v1313_v56 }
 0x2f9   : > { %1404 = vst [vmem:[%s2379_s28 + $0x178] sm:$0xff] %v1315_v58 }
 0x2fb   : > { %v1318_v59 = vpop.f32.mrb[48].mxu1 }
 0x2fc   : > { %v1319_v60 = vadd.f32 %v1318_v59, %v2371_v37  ;;  %v1320_v61 = vpop.f32.mrb[49].mxu1 }
 0x2fd   : > { %v1321_v62 = vadd.f32 %v1320_v61, %v2375_v38  ;;  %v1322_v63 = vpop.f32.mrb[50].mxu1 }
 0x2fe   : > { %1405 = vst [vmem:[%s2379_s28 + $0x180] sm:$0xff] %v1319_v60  ;;  %v1323_v0 = vadd.f32 %v1322_v63, %v2371_v37  ;;  %v1324_v1 = vpop.f32.mrb[51].mxu1 }
 0x2ff   : > { %1406 = vst [vmem:[%s2379_s28 + $0x188] sm:$0xff] %v1321_v62  ;;  %v1325_v2 = vadd.f32 %v1324_v1, %v2375_v38 }
 0x300   : > { %1407 = vst [vmem:[%s2379_s28 + $0x190] sm:$0xff] %v1323_v0 }
 0x301   : > { %1408 = vst [vmem:[%s2379_s28 + $0x198] sm:$0xff] %v1325_v2 }
 0x303   : > { %v1328_v3 = vpop.f32.mrb[52].mxu1 }
 0x304   : > { %v1329_v4 = vadd.f32 %v1328_v3, %v2371_v37  ;;  %v1330_v5 = vpop.f32.mrb[53].mxu1 }
 0x305   : > { %v1331_v6 = vadd.f32 %v1330_v5, %v2375_v38  ;;  %v1332_v7 = vpop.f32.mrb[54].mxu1 }
 0x306   : > { %1409 = vst [vmem:[%s2379_s28 + $0x1a0] sm:$0xff] %v1329_v4  ;;  %v1333_v8 = vadd.f32 %v1332_v7, %v2371_v37  ;;  %v1334_v9 = vpop.f32.mrb[55].mxu1 }
 0x307   : > { %1410 = vst [vmem:[%s2379_s28 + $0x1a8] sm:$0xff] %v1331_v6  ;;  %v1335_v10 = vadd.f32 %v1334_v9, %v2375_v38 }
 0x308   : > { %1411 = vst [vmem:[%s2379_s28 + $0x1b0] sm:$0xff] %v1333_v8 }
 0x309   : > { %1412 = vst [vmem:[%s2379_s28 + $0x1b8] sm:$0xff] %v1335_v10 }
 0x30b   : > { %v1338_v11 = vpop.f32.mrb[56].mxu1 }
 0x30c   : > { %v1339_v12 = vadd.f32 %v1338_v11, %v2371_v37  ;;  %v1340_v13 = vpop.f32.mrb[57].mxu1 }
 0x30d   : > { %v1341_v14 = vadd.f32 %v1340_v13, %v2375_v38  ;;  %v1342_v15 = vpop.f32.mrb[58].mxu1 }
 0x30e   : > { %1413 = vst [vmem:[%s2379_s28 + $0x1c0] sm:$0xff] %v1339_v12  ;;  %v1343_v16 = vadd.f32 %v1342_v15, %v2371_v37  ;;  %v1344_v17 = vpop.f32.mrb[59].mxu1 }
 0x30f   : > { %1414 = vst [vmem:[%s2379_s28 + $0x1c8] sm:$0xff] %v1341_v14  ;;  %v1345_v18 = vadd.f32 %v1344_v17, %v2375_v38 }
 0x310   : > { %1415 = vst [vmem:[%s2379_s28 + $0x1d0] sm:$0xff] %v1343_v16 }
 0x311   : > { %1416 = vst [vmem:[%s2379_s28 + $0x1d8] sm:$0xff] %v1345_v18 }
 0x313   : > { %v1348_v19 = vpop.f32.mrb[60].mxu1 }
 0x314   : > { %v1349_v20 = vadd.f32 %v1348_v19, %v2371_v37  ;;  %v1350_v21 = vpop.f32.mrb[61].mxu1 }
 0x315   : > { %v1351_v22 = vadd.f32 %v1350_v21, %v2375_v38  ;;  %v1352_v23 = vpop.f32.mrb[62].mxu1 }
 0x316   : > { %1417 = vst [vmem:[%s2379_s28 + $0x1e0] sm:$0xff] %v1349_v20  ;;  %v1353_v24 = vadd.f32 %v1352_v23, %v2371_v37  ;;  %v1354_v25 = vpop.f32.mrb[63].mxu1 }
 0x317   : > { %1418 = vst [vmem:[%s2379_s28 + $0x1e8] sm:$0xff] %v1351_v22  ;;  %v1355_v26 = vadd.f32 %v1354_v25, %v2375_v38 }
 0x318   : > { %1419 = vst [vmem:[%s2379_s28 + $0x1f0] sm:$0xff] %v1353_v24 }
 0x319   : > { %1420 = vst [vmem:[%s2379_s28 + $0x1f8] sm:$0xff] %v1355_v26 }
 0x31a   : > { %1962 = shalt.err (!%p1959_p1)
}
 0x31b   : > { %s1963_s24 = scalar_lea.hbm %s2508_s17, 8192  ;;  %s1967_s16 = scalar_lea.hbm %s2563_s5, 16384 }
 0x31c   : > { %p1964_p13 = scmp.ne.s32.totalorder %s2508_s17, %s1963_s24  ;;  %p1968_p4 = scmp.lt.u32.totalorder %s2508_s17, %s2563_s5 }
 0x31d   : > { %p1969_p5 = scmp.lt.u32.totalorder %s1967_s16, %s1963_s24  ;;  %p1971_p11 = scmp.lt.u32.totalorder %s1963_s24, %s2508_s17 }
 0x31e   : > { %p1965_p6 = pnand %p1964_p13, %p2577_p0 }
 0x31f   : > { %p1970_p8 = por %p1969_p5, %p1968_p4 }
 0x320   : > { %p1966_p10 = pneg %p1965_p6 }
 0x321   : > { %p1972_p2 = por %p1971_p11, %p1970_p8 }
 0x323   : > { %p1973_p3 = pnand %p1972_p2, %p1966_p10 }
 0x325   : > { %1976 = shalt.err (!%p1973_p3)
}
 0x326   : > { %s2027_s12 = smov 256   ;;  %s2028_s30 = smov 16  }
 0x327   : > { %1658 = dma.vmem_to_hbm [thread:$0]  (%p2577_p0), %s2510_s13, 8192, %s2508_s17, %s1422_s22, %s2027_s12, %s2027_s12, %s2028_s30  }
 0x328 PF: > { %s1451_s11 = sand.u32 1, %s2007_s18   ;;  %p2578_p7 = scmp.ne.s32.totalorder %s2568_s25, 0 }
 0x329   : > { %p2579_p9 = scmp.ge.s32.totalorder %s2019_s21, 2  ;;  %s1452_s7 = scalar_lea.sflag [#allocation4], %s1451_s11 }
 0x32b   : > { %p1672_p12 = pnand %p2579_p9, %p2578_p7 }
 0x32d   : > { %2002 = dma.done.wait (!%p1672_p12), %s1452_s7, 8192  }
 0x32e   : > { %2004 = vsyncadd (!%p1672_p12), %s1452_s7, 4294959104  ;;  %p19_p1 = scmp.ge.s32.totalorder %s2175_s29, 4   ;;  %s2580_s18 = smov %s2011_s19 }
 0x32f   : > { %s2581_s19 = smov %s2015_s20  ;;  %s2582_s20 = smov %s2191_s27 }
 0x330   : > { %s2583_s21 = smov %s2175_s29  ;;  %21 = sbr.rel (!%p19_p1) target bundleno = 6 (0x6), region = 93 }
 0x337   :  { %1457 = vsyncpa [#allocation3], 1 }
 0x338   :  { %1459 = vsyncpa [#allocation3 + $0x1], 1 }
 0x339   :  { %1460 = vsyncpa [#allocation6], 1 }
 0x33a   :  { %1461 = vsyncpa [#allocation4], 1 }
 0x33b   :  { %1463 = vsyncpa [#allocation4 + $0x1], 1 }

</bundles_post_ra>
